<compile_context>
chip_gen: v7x
topology: tpu7x:2x2x1
jax: 0.10.0
libtpu: 0.0.40
codegen_flags: <defaults>
</compile_context>

<pallas_src>
import jax
import jax.numpy as jnp
from jax.experimental import pallas as pl
from jax.experimental.pallas import tpu as pltpu

BATCH    = 2
SEQ      = 8
D_MODEL  = 32
N_HEAD   = 4
D_HEAD   = D_MODEL // N_HEAD
D_MLP    = 64
N_LAYERS = 2
SCALE    = D_HEAD ** -0.5
LN_EPS   = 1e-5
ROWS     = BATCH * SEQ          # batch folded into the row axis
NEG_INF  = -1e30                # finite "minus infinity" for the block-diagonal mask


def _layernorm(x, g, b):
    mu = jnp.mean(x, axis=-1, keepdims=True)
    var = jnp.mean((x - mu) ** 2, axis=-1, keepdims=True)
    return (x - mu) * jax.lax.rsqrt(var + LN_EPS) * g + b


def _gelu_exact(x):
    # exact GELU (erf), matching nn.GELU() default
    return 0.5 * x * (1.0 + jax.lax.erf(x * (2.0 ** -0.5)))


def transformer_kernel(x_ref, bias_ref, ln1_g_ref, ln1_b_ref, wqk_h_ref, wv_pad_ref,
                       ln2_g_ref, ln2_b_ref, w1_ref, b1_ref, w2_ref, b2_ref,
                       out_ref):
    # Load everything once; all layers reuse the same weights (shared block).
    x      = x_ref[...]            # (ROWS, D_MODEL)
    bias   = bias_ref[...]         # (ROWS, ROWS) block-diagonal additive attention mask
    ln1_g  = ln1_g_ref[...]
    ln1_b  = ln1_b_ref[...]
    ln2_g  = ln2_g_ref[...]
    ln2_b  = ln2_b_ref[...]
    wqk_h  = wqk_h_ref[...]        # (2*N_HEAD, D_MODEL, D_HEAD): [q heads (pre-scaled) | k heads]
    wv_pad = wv_pad_ref[...]       # (N_HEAD, D_MODEL, D_MODEL): per-head column-padded V weights
    w1 = w1_ref[...]; b1 = b1_ref[...]
    w2 = w2_ref[...]; b2 = b2_ref[...]

    for _ in range(N_LAYERS):      # static unroll; parameters shared across layers
        # ---------- attention sub-block: x = MHA(LN1(x)) + x ----------
        y = _layernorm(x, ln1_g, ln1_b)                               # (ROWS, D)

        # Head-major Q and K in one batched dot (scale already folded into the Q weights).
        y_qk = jnp.broadcast_to(y[None], (2 * N_HEAD, ROWS, D_MODEL))
        qk = jax.lax.dot_general(                                     # (2H, ROWS, D_HEAD)
            y_qk, wqk_h, (((2,), (1,)), ((0,), (0,))),
            preferred_element_type=jnp.float32)
        q = qk[:N_HEAD]                                               # (H, ROWS, D_HEAD)
        k = qk[N_HEAD:]                                               # (H, ROWS, D_HEAD)

        # Per-head V with column padding: head h's values live in lanes [h*dh, (h+1)*dh).
        y_v = jnp.broadcast_to(y[None], (N_HEAD, ROWS, D_MODEL))
        v = jax.lax.dot_general(                                      # (H, ROWS, D_MODEL)
            y_v, wv_pad, (((2,), (1,)), ((0,), (0,))),
            preferred_element_type=jnp.float32)

        # scores[h, i, j] = q[h, i, :] . k[h, j, :]  — batched over heads
        scores = jax.lax.dot_general(
            q, k, (((2,), (2,)), ((0,), (0,))),
            preferred_element_type=jnp.float32)                       # (H, ROWS, ROWS)
        scores = scores + bias                                        # kill cross-batch attention
        scores = scores - jnp.max(scores, axis=-1, keepdims=True)
        p = jnp.exp(scores)
        denom = jnp.sum(p, axis=-1, keepdims=True)
        # Exact reciprocal keeps us well inside the 1e-4 check; approx=True is the
        # EUP-slot perf option at realistic sizes.
        p = p * pl.reciprocal(denom, approx=False)

        # Per-head attention output in full-width (padded) lanes, then accumulate over heads.
        # Equivalent to the head concat (other heads contribute exact zeros) — no lane ops.
        o = jax.lax.dot_general(
            p, v, (((2,), (1,)), ((0,), (0,))),
            preferred_element_type=jnp.float32)                       # (H, ROWS, D_MODEL)
        attn = o[0]
        for h in range(1, N_HEAD):
            attn = attn + o[h]
        x = attn + x

        # ---------- mlp sub-block: x = FF(LN2(x)) + x ----------
        z = _layernorm(x, ln2_g, ln2_b)
        h1 = jnp.dot(z, w1, preferred_element_type=jnp.float32) + b1
        h1 = _gelu_exact(h1)
        x = jnp.dot(h1, w2, preferred_element_type=jnp.float32) + b2 + x

    # Single writeback at the end. (When scaling up, present a lane-dense (multiple-of-128)
    # last dim here; with D_MODEL=32 the win is negligible.)
    out_ref[...] = x


@jax.jit
def transformer_forward(x, params):
    (ln1_g, ln1_b, wqkv, ln2_g, ln2_b, w1, b1, w2, b2) = params
    B, N, D = x.shape
    x2 = x.reshape(B * N, D)                                   # fold batch into rows

    # Split fused QKV weight (D, 3D) into per-kind (D, D) blocks.
    wq = wqkv[:, 0 * D:1 * D]
    wk = wqkv[:, 1 * D:2 * D]
    wv = wqkv[:, 2 * D:3 * D]

    # Head-major Q/K weights: (D, D) -> (N_HEAD, D, D_HEAD); fold softmax scale into Q once.
    to_heads = lambda w: w.reshape(D, N_HEAD, D_HEAD).transpose(1, 0, 2)
    wqk_heads = jnp.concatenate([to_heads(wq) * SCALE, to_heads(wk)], axis=0)   # (2H, D, dh)

    # Per-head column-padded V weights: wv_pad[h, :, d] = wv[:, d] iff column d belongs to head h.
    head_of_col = jnp.arange(D) // D_HEAD                                        # (D,)
    head_mask = (head_of_col[None, :] == jnp.arange(N_HEAD)[:, None]).astype(jnp.float32)  # (H, D)
    wv_pad = wv[None, :, :] * head_mask[:, None, :]                              # (H, D, D)

    # Block-diagonal additive mask: row i may only attend to rows of the same batch element.
    row_b = jnp.arange(B * N) // N
    attn_bias = jnp.where(row_b[:, None] == row_b[None, :], 0.0, NEG_INF).astype(jnp.float32)

    full = lambda a: pl.BlockSpec(a.shape, lambda i: (0,) * a.ndim)

    out2 = pl.pallas_call(
        transformer_kernel,
        out_shape=jax.ShapeDtypeStruct((B * N, D), jnp.float32),
        grid=(1,),   # single grid step: whole batch + all (weight-shared) layers fused
        in_specs=[full(x2), full(attn_bias),
                  full(ln1_g), full(ln1_b), full(wqk_heads), full(wv_pad),
                  full(ln2_g), full(ln2_b),
                  full(w1), full(b1), full(w2), full(b2)],
        out_specs=pl.BlockSpec((B * N, D), lambda i: (0, 0)),
        compiler_params=pltpu.CompilerParams(dimension_semantics=("arbitrary",)),
    )(x2, attn_bias, ln1_g, ln1_b, wqk_heads, wv_pad, ln2_g, ln2_b, w1, b1, w2, b2)
    return out2.reshape(B, N, D)


# ---------------- pure-JAX reference (for correctness check) ----------------
def _ref_forward(x, params):
    (ln1_g, ln1_b, wqkv, ln2_g, ln2_b, w1, b1, w2, b2) = params

    def ln(t, g, b):
        mu = jnp.mean(t, axis=-1, keepdims=True)
        var = jnp.mean((t - mu) ** 2, axis=-1, keepdims=True)
        return (t - mu) / jnp.sqrt(var + LN_EPS) * g[0] + b[0]

    for _ in range(N_LAYERS):
        y = ln(x, ln1_g, ln1_b)
        qkv = y @ wqkv
        q, k, v = jnp.split(qkv, 3, axis=-1)
        B, N, _ = q.shape
        rh = lambda t: t.reshape(B, N, N_HEAD, D_HEAD).transpose(0, 2, 1, 3)
        qh, kh, vh = rh(q), rh(k), rh(v)
        s = jnp.einsum('bhid,bhjd->bhij', qh, kh) * SCALE
        p = jax.nn.softmax(s, axis=-1)
        o = jnp.einsum('bhij,bhjd->bhid', p, vh)
        o = o.transpose(0, 2, 1, 3).reshape(B, N, D_MODEL)
        x = o + x
        z = ln(x, ln2_g, ln2_b)
        pre = z @ w1 + b1[0]
        h1 = 0.5 * pre * (1.0 + jax.lax.erf(pre * 2.0 ** -0.5))
        x = (h1 @ w2 + b2[0]) + x
    return x


def _init_params(key):
    ks = jax.random.split(key, 9)
    std = 0.02
    ln1_g = 1.0 + 0.1 * jax.random.normal(ks[0], (1, D_MODEL), jnp.float32)
    ln1_b = 0.1 * jax.random.normal(ks[1], (1, D_MODEL), jnp.float32)
    wqkv  = std * jax.random.normal(ks[2], (D_MODEL, 3 * D_MODEL), jnp.float32)
    ln2_g = 1.0 + 0.1 * jax.random.normal(ks[3], (1, D_MODEL), jnp.float32)
    ln2_b = 0.1 * jax.random.normal(ks[4], (1, D_MODEL), jnp.float32)
    w1    = std * jax.random.normal(ks[5], (D_MODEL, D_MLP), jnp.float32)
    b1    = std * jax.random.normal(ks[6], (1, D_MLP), jnp.float32)
    w2    = std * jax.random.normal(ks[7], (D_MLP, D_MODEL), jnp.float32)
    b2    = std * jax.random.normal(ks[8], (1, D_MODEL), jnp.float32)
    return (ln1_g, ln1_b, wqkv, ln2_g, ln2_b, w1, b1, w2, b2)


if __name__ == "__main__":
    key = jax.random.PRNGKey(0)
    kx, kp = jax.random.split(key)
    x = jax.random.normal(kx, (BATCH, SEQ, D_MODEL), jnp.float32)
    params = _init_params(kp)

    out = jax.block_until_ready(transformer_forward(x, params))
    ref = _ref_forward(x, params)

    assert out.shape == (BATCH, SEQ, D_MODEL)
    assert jnp.allclose(out, ref, rtol=1e-4, atol=1e-4), \
        f"max abs err = {jnp.max(jnp.abs(out - ref))}"

    print("KERNEL_OK")
</pallas_src>

<mosaic_0001>
module attributes {stable_mosaic.version = 11 : i64} {
  func.func @transformer_kernel(%arg0: i32, %arg1: memref<16x32xf32, #tpu.memory_space<vmem>>, %arg2: memref<16x16xf32, #tpu.memory_space<vmem>>, %arg3: memref<1x32xf32, #tpu.memory_space<vmem>>, %arg4: memref<1x32xf32, #tpu.memory_space<vmem>>, %arg5: memref<8x32x8xf32, #tpu.memory_space<vmem>>, %arg6: memref<4x32x32xf32, #tpu.memory_space<vmem>>, %arg7: memref<1x32xf32, #tpu.memory_space<vmem>>, %arg8: memref<1x32xf32, #tpu.memory_space<vmem>>, %arg9: memref<32x64xf32, #tpu.memory_space<vmem>>, %arg10: memref<1x64xf32, #tpu.memory_space<vmem>>, %arg11: memref<64x32xf32, #tpu.memory_space<vmem>>, %arg12: memref<1x32xf32, #tpu.memory_space<vmem>>, %arg13: memref<16x32xf32, #tpu.memory_space<vmem>>) attributes {dimension_semantics = [#tpu.dimension_semantics<arbitrary>], iteration_bounds = array<i64: 1>, scalar_prefetch = 0 : i64, scratch_operands = 0 : i64, tpu.core_type = #tpu.core_type<tc>, window_params = [{pipeline_mode = #tpu.pipeline_mode<synchronous>, transform_indices = @transform_0, window_bounds = array<i64: 16, 32>}, {pipeline_mode = #tpu.pipeline_mode<synchronous>, transform_indices = @transform_1, window_bounds = array<i64: 16, 16>}, {pipeline_mode = #tpu.pipeline_mode<synchronous>, transform_indices = @transform_2, window_bounds = array<i64: 1, 32>}, {pipeline_mode = #tpu.pipeline_mode<synchronous>, transform_indices = @transform_3, window_bounds = array<i64: 1, 32>}, {pipeline_mode = #tpu.pipeline_mode<synchronous>, transform_indices = @transform_4, window_bounds = array<i64: 8, 32, 8>}, {pipeline_mode = #tpu.pipeline_mode<synchronous>, transform_indices = @transform_5, window_bounds = array<i64: 4, 32, 32>}, {pipeline_mode = #tpu.pipeline_mode<synchronous>, transform_indices = @transform_6, window_bounds = array<i64: 1, 32>}, {pipeline_mode = #tpu.pipeline_mode<synchronous>, transform_indices = @transform_7, window_bounds = array<i64: 1, 32>}, {pipeline_mode = #tpu.pipeline_mode<synchronous>, transform_indices = @transform_8, window_bounds = array<i64: 32, 64>}, {pipeline_mode = #tpu.pipeline_mode<synchronous>, transform_indices = @transform_9, window_bounds = array<i64: 1, 64>}, {pipeline_mode = #tpu.pipeline_mode<synchronous>, transform_indices = @transform_10, window_bounds = array<i64: 64, 32>}, {pipeline_mode = #tpu.pipeline_mode<synchronous>, transform_indices = @transform_11, window_bounds = array<i64: 1, 32>}, {pipeline_mode = #tpu.pipeline_mode<synchronous>, transform_indices = @transform_12, window_bounds = array<i64: 16, 32>}]} {
    %c0 = arith.constant 0 : index
    %c0_0 = arith.constant 0 : index
    %0 = vector.load %arg1[%c0, %c0_0] : memref<16x32xf32, #tpu.memory_space<vmem>>, vector<16x32xf32>
    %c0_1 = arith.constant 0 : index
    %c0_2 = arith.constant 0 : index
    %1 = vector.load %arg2[%c0_1, %c0_2] : memref<16x16xf32, #tpu.memory_space<vmem>>, vector<16x16xf32>
    %c0_3 = arith.constant 0 : index
    %c0_4 = arith.constant 0 : index
    %2 = vector.load %arg3[%c0_3, %c0_4] : memref<1x32xf32, #tpu.memory_space<vmem>>, vector<1x32xf32>
    %c0_5 = arith.constant 0 : index
    %c0_6 = arith.constant 0 : index
    %3 = vector.load %arg4[%c0_5, %c0_6] : memref<1x32xf32, #tpu.memory_space<vmem>>, vector<1x32xf32>
    %c0_7 = arith.constant 0 : index
    %c0_8 = arith.constant 0 : index
    %4 = vector.load %arg7[%c0_7, %c0_8] : memref<1x32xf32, #tpu.memory_space<vmem>>, vector<1x32xf32>
    %c0_9 = arith.constant 0 : index
    %c0_10 = arith.constant 0 : index
    %5 = vector.load %arg8[%c0_9, %c0_10] : memref<1x32xf32, #tpu.memory_space<vmem>>, vector<1x32xf32>
    %c0_11 = arith.constant 0 : index
    %c0_12 = arith.constant 0 : index
    %c0_13 = arith.constant 0 : index
    %6 = vector.load %arg5[%c0_11, %c0_12, %c0_13] : memref<8x32x8xf32, #tpu.memory_space<vmem>>, vector<8x32x8xf32>
    %c0_14 = arith.constant 0 : index
    %c0_15 = arith.constant 0 : index
    %c0_16 = arith.constant 0 : index
    %7 = vector.load %arg6[%c0_14, %c0_15, %c0_16] : memref<4x32x32xf32, #tpu.memory_space<vmem>>, vector<4x32x32xf32>
    %c0_17 = arith.constant 0 : index
    %c0_18 = arith.constant 0 : index
    %8 = vector.load %arg9[%c0_17, %c0_18] : memref<32x64xf32, #tpu.memory_space<vmem>>, vector<32x64xf32>
    %c0_19 = arith.constant 0 : index
    %c0_20 = arith.constant 0 : index
    %9 = vector.load %arg10[%c0_19, %c0_20] : memref<1x64xf32, #tpu.memory_space<vmem>>, vector<1x64xf32>
    %c0_21 = arith.constant 0 : index
    %c0_22 = arith.constant 0 : index
    %10 = vector.load %arg11[%c0_21, %c0_22] : memref<64x32xf32, #tpu.memory_space<vmem>>, vector<64x32xf32>
    %c0_23 = arith.constant 0 : index
    %c0_24 = arith.constant 0 : index
    %11 = vector.load %arg12[%c0_23, %c0_24] : memref<1x32xf32, #tpu.memory_space<vmem>>, vector<1x32xf32>
    %cst = arith.constant dense<0.000000e+00> : vector<16xf32>
    %12 = vector.multi_reduction <add>, %0, %cst [1] : vector<16x32xf32> to vector<16xf32>
    %13 = vector.shape_cast %12 : vector<16xf32> to vector<16x1xf32>
    %cst_25 = arith.constant 3.200000e+01 : f32
    %14 = vector.broadcast %cst_25 : f32 to vector<16x1xf32>
    %15 = arith.divf %13, %14 : vector<16x1xf32>
    %16 = vector.broadcast %15 : vector<16x1xf32> to vector<16x32xf32>
    %17 = arith.subf %0, %16 : vector<16x32xf32>
    %18 = arith.mulf %17, %17 : vector<16x32xf32>
    %cst_26 = arith.constant dense<0.000000e+00> : vector<16xf32>
    %19 = vector.multi_reduction <add>, %18, %cst_26 [1] : vector<16x32xf32> to vector<16xf32>
    %20 = vector.shape_cast %19 : vector<16xf32> to vector<16x1xf32>
    %cst_27 = arith.constant 3.200000e+01 : f32
    %21 = vector.broadcast %cst_27 : f32 to vector<16x1xf32>
    %22 = arith.divf %20, %21 : vector<16x1xf32>
    %23 = vector.broadcast %15 : vector<16x1xf32> to vector<16x32xf32>
    %24 = arith.subf %0, %23 : vector<16x32xf32>
    %cst_28 = arith.constant 9.99999974E-6 : f32
    %25 = vector.broadcast %cst_28 : f32 to vector<16x1xf32>
    %26 = arith.addf %22, %25 : vector<16x1xf32>
    %27 = math.rsqrt %26 : vector<16x1xf32>
    %28 = vector.broadcast %27 : vector<16x1xf32> to vector<16x32xf32>
    %29 = arith.mulf %24, %28 : vector<16x32xf32>
    %30 = vector.broadcast %2 : vector<1x32xf32> to vector<16x32xf32>
    %31 = arith.mulf %29, %30 : vector<16x32xf32>
    %32 = vector.broadcast %3 : vector<1x32xf32> to vector<16x32xf32>
    %33 = arith.addf %31, %32 : vector<16x32xf32>
    %34 = vector.shape_cast %33 : vector<16x32xf32> to vector<1x16x32xf32>
    %35 = vector.shape_cast %34 : vector<1x16x32xf32> to vector<1x16x32xf32>
    %36 = vector.broadcast %35 : vector<1x16x32xf32> to vector<8x16x32xf32>
    %cst_29 = arith.constant dense<0.000000e+00> : vector<8x16x8xf32>
    %37 = tpu.matmul %36, %6, %cst_29 {dimension_numbers = #tpu.dot_dimension_numbers<[2], [1], [1], [2], [0, 0, 0, 1, 1, 2], [0], [0]>} : vector<8x16x32xf32>, vector<8x32x8xf32>, vector<8x16x8xf32> -> vector<8x16x8xf32>
    %38 = vector.extract_strided_slice %37 {offsets = [0, 0, 0], sizes = [4, 16, 8], strides = [1, 1, 1]} : vector<8x16x8xf32> to vector<4x16x8xf32>
    %39 = vector.extract_strided_slice %37 {offsets = [4, 0, 0], sizes = [4, 16, 8], strides = [1, 1, 1]} : vector<8x16x8xf32> to vector<4x16x8xf32>
    %40 = vector.shape_cast %33 : vector<16x32xf32> to vector<1x16x32xf32>
    %41 = vector.shape_cast %40 : vector<1x16x32xf32> to vector<1x16x32xf32>
    %42 = vector.broadcast %41 : vector<1x16x32xf32> to vector<4x16x32xf32>
    %cst_30 = arith.constant dense<0.000000e+00> : vector<4x16x32xf32>
    %43 = tpu.matmul %42, %7, %cst_30 {dimension_numbers = #tpu.dot_dimension_numbers<[2], [1], [1], [2], [0, 0, 0, 1, 1, 2], [0], [0]>} : vector<4x16x32xf32>, vector<4x32x32xf32>, vector<4x16x32xf32> -> vector<4x16x32xf32>
    %cst_31 = arith.constant dense<0.000000e+00> : vector<4x16x16xf32>
    %44 = tpu.matmul %38, %39, %cst_31 {dimension_numbers = #tpu.dot_dimension_numbers<[2], [2], [1], [1], [0, 0, 0, 1, 1, 1], [0], [0]>} : vector<4x16x8xf32>, vector<4x16x8xf32>, vector<4x16x16xf32> -> vector<4x16x16xf32>
    %45 = vector.shape_cast %1 : vector<16x16xf32> to vector<1x16x16xf32>
    %46 = vector.broadcast %45 : vector<1x16x16xf32> to vector<4x16x16xf32>
    %47 = arith.addf %44, %46 : vector<4x16x16xf32>
    %cst_32 = arith.constant dense<0xFF800000> : vector<4x16xf32>
    %48 = vector.multi_reduction <maximumf>, %47, %cst_32 [2] : vector<4x16x16xf32> to vector<4x16xf32>
    %49 = vector.shape_cast %48 : vector<4x16xf32> to vector<4x16x1xf32>
    %50 = vector.broadcast %49 : vector<4x16x1xf32> to vector<4x16x16xf32>
    %51 = arith.subf %47, %50 : vector<4x16x16xf32>
    %52 = math.exp %51 : vector<4x16x16xf32>
    %cst_33 = arith.constant dense<0.000000e+00> : vector<4x16xf32>
    %53 = vector.multi_reduction <add>, %52, %cst_33 [2] : vector<4x16x16xf32> to vector<4x16xf32>
    %54 = vector.shape_cast %53 : vector<4x16xf32> to vector<4x16x1xf32>
    %55 = tpu.reciprocal %54 : vector<4x16x1xf32> -> vector<4x16x1xf32>
    %56 = vector.broadcast %55 : vector<4x16x1xf32> to vector<4x16x16xf32>
    %57 = arith.mulf %52, %56 : vector<4x16x16xf32>
    %cst_34 = arith.constant dense<0.000000e+00> : vector<4x16x32xf32>
    %58 = tpu.matmul %57, %43, %cst_34 {dimension_numbers = #tpu.dot_dimension_numbers<[2], [1], [1], [2], [0, 0, 0, 1, 1, 2], [0], [0]>} : vector<4x16x16xf32>, vector<4x16x32xf32>, vector<4x16x32xf32> -> vector<4x16x32xf32>
    %59 = vector.extract_strided_slice %58 {offsets = [0, 0, 0], sizes = [1, 16, 32], strides = [1, 1, 1]} : vector<4x16x32xf32> to vector<1x16x32xf32>
    %60 = vector.shape_cast %59 : vector<1x16x32xf32> to vector<16x32xf32>
    %61 = vector.extract_strided_slice %58 {offsets = [1, 0, 0], sizes = [1, 16, 32], strides = [1, 1, 1]} : vector<4x16x32xf32> to vector<1x16x32xf32>
    %62 = vector.shape_cast %61 : vector<1x16x32xf32> to vector<16x32xf32>
    %63 = arith.addf %60, %62 : vector<16x32xf32>
    %64 = vector.extract_strided_slice %58 {offsets = [2, 0, 0], sizes = [1, 16, 32], strides = [1, 1, 1]} : vector<4x16x32xf32> to vector<1x16x32xf32>
    %65 = vector.shape_cast %64 : vector<1x16x32xf32> to vector<16x32xf32>
    %66 = arith.addf %63, %65 : vector<16x32xf32>
    %67 = vector.extract_strided_slice %58 {offsets = [3, 0, 0], sizes = [1, 16, 32], strides = [1, 1, 1]} : vector<4x16x32xf32> to vector<1x16x32xf32>
    %68 = vector.shape_cast %67 : vector<1x16x32xf32> to vector<16x32xf32>
    %69 = arith.addf %66, %68 : vector<16x32xf32>
    %70 = arith.addf %69, %0 : vector<16x32xf32>
    %cst_35 = arith.constant dense<0.000000e+00> : vector<16xf32>
    %71 = vector.multi_reduction <add>, %70, %cst_35 [1] : vector<16x32xf32> to vector<16xf32>
    %72 = vector.shape_cast %71 : vector<16xf32> to vector<16x1xf32>
    %cst_36 = arith.constant 3.200000e+01 : f32
    %73 = vector.broadcast %cst_36 : f32 to vector<16x1xf32>
    %74 = arith.divf %72, %73 : vector<16x1xf32>
    %75 = vector.broadcast %74 : vector<16x1xf32> to vector<16x32xf32>
    %76 = arith.subf %70, %75 : vector<16x32xf32>
    %77 = arith.mulf %76, %76 : vector<16x32xf32>
    %cst_37 = arith.constant dense<0.000000e+00> : vector<16xf32>
    %78 = vector.multi_reduction <add>, %77, %cst_37 [1] : vector<16x32xf32> to vector<16xf32>
    %79 = vector.shape_cast %78 : vector<16xf32> to vector<16x1xf32>
    %cst_38 = arith.constant 3.200000e+01 : f32
    %80 = vector.broadcast %cst_38 : f32 to vector<16x1xf32>
    %81 = arith.divf %79, %80 : vector<16x1xf32>
    %82 = vector.broadcast %74 : vector<16x1xf32> to vector<16x32xf32>
    %83 = arith.subf %70, %82 : vector<16x32xf32>
    %cst_39 = arith.constant 9.99999974E-6 : f32
    %84 = vector.broadcast %cst_39 : f32 to vector<16x1xf32>
    %85 = arith.addf %81, %84 : vector<16x1xf32>
    %86 = math.rsqrt %85 : vector<16x1xf32>
    %87 = vector.broadcast %86 : vector<16x1xf32> to vector<16x32xf32>
    %88 = arith.mulf %83, %87 : vector<16x32xf32>
    %89 = vector.broadcast %4 : vector<1x32xf32> to vector<16x32xf32>
    %90 = arith.mulf %88, %89 : vector<16x32xf32>
    %91 = vector.broadcast %5 : vector<1x32xf32> to vector<16x32xf32>
    %92 = arith.addf %90, %91 : vector<16x32xf32>
    %cst_40 = arith.constant dense<0.000000e+00> : vector<16x64xf32>
    %93 = tpu.matmul %92, %8, %cst_40 {dimension_numbers = #tpu.dot_dimension_numbers<[1], [0], [0], [1], [0, 0, 1, 1], [], []>} : vector<16x32xf32>, vector<32x64xf32>, vector<16x64xf32> -> vector<16x64xf32>
    %94 = vector.broadcast %9 : vector<1x64xf32> to vector<16x64xf32>
    %95 = arith.addf %93, %94 : vector<16x64xf32>
    %cst_41 = arith.constant 5.000000e-01 : f32
    %96 = vector.broadcast %cst_41 : f32 to vector<16x64xf32>
    %97 = arith.mulf %96, %95 : vector<16x64xf32>
    %cst_42 = arith.constant 0.707106769 : f32
    %98 = vector.broadcast %cst_42 : f32 to vector<16x64xf32>
    %99 = arith.mulf %95, %98 : vector<16x64xf32>
    %100 = math.erf %99 : vector<16x64xf32>
    %cst_43 = arith.constant 1.000000e+00 : f32
    %101 = vector.broadcast %cst_43 : f32 to vector<16x64xf32>
    %102 = arith.addf %101, %100 : vector<16x64xf32>
    %103 = arith.mulf %97, %102 : vector<16x64xf32>
    %cst_44 = arith.constant dense<0.000000e+00> : vector<16x32xf32>
    %104 = tpu.matmul %103, %10, %cst_44 {dimension_numbers = #tpu.dot_dimension_numbers<[1], [0], [0], [1], [0, 0, 1, 1], [], []>} : vector<16x64xf32>, vector<64x32xf32>, vector<16x32xf32> -> vector<16x32xf32>
    %105 = vector.broadcast %11 : vector<1x32xf32> to vector<16x32xf32>
    %106 = arith.addf %104, %105 : vector<16x32xf32>
    %107 = arith.addf %106, %70 : vector<16x32xf32>
    %cst_45 = arith.constant dense<0.000000e+00> : vector<16xf32>
    %108 = vector.multi_reduction <add>, %107, %cst_45 [1] : vector<16x32xf32> to vector<16xf32>
    %109 = vector.shape_cast %108 : vector<16xf32> to vector<16x1xf32>
    %cst_46 = arith.constant 3.200000e+01 : f32
    %110 = vector.broadcast %cst_46 : f32 to vector<16x1xf32>
    %111 = arith.divf %109, %110 : vector<16x1xf32>
    %112 = vector.broadcast %111 : vector<16x1xf32> to vector<16x32xf32>
    %113 = arith.subf %107, %112 : vector<16x32xf32>
    %114 = arith.mulf %113, %113 : vector<16x32xf32>
    %cst_47 = arith.constant dense<0.000000e+00> : vector<16xf32>
    %115 = vector.multi_reduction <add>, %114, %cst_47 [1] : vector<16x32xf32> to vector<16xf32>
    %116 = vector.shape_cast %115 : vector<16xf32> to vector<16x1xf32>
    %cst_48 = arith.constant 3.200000e+01 : f32
    %117 = vector.broadcast %cst_48 : f32 to vector<16x1xf32>
    %118 = arith.divf %116, %117 : vector<16x1xf32>
    %119 = vector.broadcast %111 : vector<16x1xf32> to vector<16x32xf32>
    %120 = arith.subf %107, %119 : vector<16x32xf32>
    %cst_49 = arith.constant 9.99999974E-6 : f32
    %121 = vector.broadcast %cst_49 : f32 to vector<16x1xf32>
    %122 = arith.addf %118, %121 : vector<16x1xf32>
    %123 = math.rsqrt %122 : vector<16x1xf32>
    %124 = vector.broadcast %123 : vector<16x1xf32> to vector<16x32xf32>
    %125 = arith.mulf %120, %124 : vector<16x32xf32>
    %126 = vector.broadcast %2 : vector<1x32xf32> to vector<16x32xf32>
    %127 = arith.mulf %125, %126 : vector<16x32xf32>
    %128 = vector.broadcast %3 : vector<1x32xf32> to vector<16x32xf32>
    %129 = arith.addf %127, %128 : vector<16x32xf32>
    %130 = vector.shape_cast %129 : vector<16x32xf32> to vector<1x16x32xf32>
    %131 = vector.shape_cast %130 : vector<1x16x32xf32> to vector<1x16x32xf32>
    %132 = vector.broadcast %131 : vector<1x16x32xf32> to vector<8x16x32xf32>
    %cst_50 = arith.constant dense<0.000000e+00> : vector<8x16x8xf32>
    %133 = tpu.matmul %132, %6, %cst_50 {dimension_numbers = #tpu.dot_dimension_numbers<[2], [1], [1], [2], [0, 0, 0, 1, 1, 2], [0], [0]>} : vector<8x16x32xf32>, vector<8x32x8xf32>, vector<8x16x8xf32> -> vector<8x16x8xf32>
    %134 = vector.extract_strided_slice %133 {offsets = [0, 0, 0], sizes = [4, 16, 8], strides = [1, 1, 1]} : vector<8x16x8xf32> to vector<4x16x8xf32>
    %135 = vector.extract_strided_slice %133 {offsets = [4, 0, 0], sizes = [4, 16, 8], strides = [1, 1, 1]} : vector<8x16x8xf32> to vector<4x16x8xf32>
    %136 = vector.shape_cast %129 : vector<16x32xf32> to vector<1x16x32xf32>
    %137 = vector.shape_cast %136 : vector<1x16x32xf32> to vector<1x16x32xf32>
    %138 = vector.broadcast %137 : vector<1x16x32xf32> to vector<4x16x32xf32>
    %cst_51 = arith.constant dense<0.000000e+00> : vector<4x16x32xf32>
    %139 = tpu.matmul %138, %7, %cst_51 {dimension_numbers = #tpu.dot_dimension_numbers<[2], [1], [1], [2], [0, 0, 0, 1, 1, 2], [0], [0]>} : vector<4x16x32xf32>, vector<4x32x32xf32>, vector<4x16x32xf32> -> vector<4x16x32xf32>
    %cst_52 = arith.constant dense<0.000000e+00> : vector<4x16x16xf32>
    %140 = tpu.matmul %134, %135, %cst_52 {dimension_numbers = #tpu.dot_dimension_numbers<[2], [2], [1], [1], [0, 0, 0, 1, 1, 1], [0], [0]>} : vector<4x16x8xf32>, vector<4x16x8xf32>, vector<4x16x16xf32> -> vector<4x16x16xf32>
    %141 = vector.shape_cast %1 : vector<16x16xf32> to vector<1x16x16xf32>
    %142 = vector.broadcast %141 : vector<1x16x16xf32> to vector<4x16x16xf32>
    %143 = arith.addf %140, %142 : vector<4x16x16xf32>
    %cst_53 = arith.constant dense<0xFF800000> : vector<4x16xf32>
    %144 = vector.multi_reduction <maximumf>, %143, %cst_53 [2] : vector<4x16x16xf32> to vector<4x16xf32>
    %145 = vector.shape_cast %144 : vector<4x16xf32> to vector<4x16x1xf32>
    %146 = vector.broadcast %145 : vector<4x16x1xf32> to vector<4x16x16xf32>
    %147 = arith.subf %143, %146 : vector<4x16x16xf32>
    %148 = math.exp %147 : vector<4x16x16xf32>
    %cst_54 = arith.constant dense<0.000000e+00> : vector<4x16xf32>
    %149 = vector.multi_reduction <add>, %148, %cst_54 [2] : vector<4x16x16xf32> to vector<4x16xf32>
    %150 = vector.shape_cast %149 : vector<4x16xf32> to vector<4x16x1xf32>
    %151 = tpu.reciprocal %150 : vector<4x16x1xf32> -> vector<4x16x1xf32>
    %152 = vector.broadcast %151 : vector<4x16x1xf32> to vector<4x16x16xf32>
    %153 = arith.mulf %148, %152 : vector<4x16x16xf32>
    %cst_55 = arith.constant dense<0.000000e+00> : vector<4x16x32xf32>
    %154 = tpu.matmul %153, %139, %cst_55 {dimension_numbers = #tpu.dot_dimension_numbers<[2], [1], [1], [2], [0, 0, 0, 1, 1, 2], [0], [0]>} : vector<4x16x16xf32>, vector<4x16x32xf32>, vector<4x16x32xf32> -> vector<4x16x32xf32>
    %155 = vector.extract_strided_slice %154 {offsets = [0, 0, 0], sizes = [1, 16, 32], strides = [1, 1, 1]} : vector<4x16x32xf32> to vector<1x16x32xf32>
    %156 = vector.shape_cast %155 : vector<1x16x32xf32> to vector<16x32xf32>
    %157 = vector.extract_strided_slice %154 {offsets = [1, 0, 0], sizes = [1, 16, 32], strides = [1, 1, 1]} : vector<4x16x32xf32> to vector<1x16x32xf32>
    %158 = vector.shape_cast %157 : vector<1x16x32xf32> to vector<16x32xf32>
    %159 = arith.addf %156, %158 : vector<16x32xf32>
    %160 = vector.extract_strided_slice %154 {offsets = [2, 0, 0], sizes = [1, 16, 32], strides = [1, 1, 1]} : vector<4x16x32xf32> to vector<1x16x32xf32>
    %161 = vector.shape_cast %160 : vector<1x16x32xf32> to vector<16x32xf32>
    %162 = arith.addf %159, %161 : vector<16x32xf32>
    %163 = vector.extract_strided_slice %154 {offsets = [3, 0, 0], sizes = [1, 16, 32], strides = [1, 1, 1]} : vector<4x16x32xf32> to vector<1x16x32xf32>
    %164 = vector.shape_cast %163 : vector<1x16x32xf32> to vector<16x32xf32>
    %165 = arith.addf %162, %164 : vector<16x32xf32>
    %166 = arith.addf %165, %107 : vector<16x32xf32>
    %cst_56 = arith.constant dense<0.000000e+00> : vector<16xf32>
    %167 = vector.multi_reduction <add>, %166, %cst_56 [1] : vector<16x32xf32> to vector<16xf32>
    %168 = vector.shape_cast %167 : vector<16xf32> to vector<16x1xf32>
    %cst_57 = arith.constant 3.200000e+01 : f32
    %169 = vector.broadcast %cst_57 : f32 to vector<16x1xf32>
    %170 = arith.divf %168, %169 : vector<16x1xf32>
    %171 = vector.broadcast %170 : vector<16x1xf32> to vector<16x32xf32>
    %172 = arith.subf %166, %171 : vector<16x32xf32>
    %173 = arith.mulf %172, %172 : vector<16x32xf32>
    %cst_58 = arith.constant dense<0.000000e+00> : vector<16xf32>
    %174 = vector.multi_reduction <add>, %173, %cst_58 [1] : vector<16x32xf32> to vector<16xf32>
    %175 = vector.shape_cast %174 : vector<16xf32> to vector<16x1xf32>
    %cst_59 = arith.constant 3.200000e+01 : f32
    %176 = vector.broadcast %cst_59 : f32 to vector<16x1xf32>
    %177 = arith.divf %175, %176 : vector<16x1xf32>
    %178 = vector.broadcast %170 : vector<16x1xf32> to vector<16x32xf32>
    %179 = arith.subf %166, %178 : vector<16x32xf32>
    %cst_60 = arith.constant 9.99999974E-6 : f32
    %180 = vector.broadcast %cst_60 : f32 to vector<16x1xf32>
    %181 = arith.addf %177, %180 : vector<16x1xf32>
    %182 = math.rsqrt %181 : vector<16x1xf32>
    %183 = vector.broadcast %182 : vector<16x1xf32> to vector<16x32xf32>
    %184 = arith.mulf %179, %183 : vector<16x32xf32>
    %185 = vector.broadcast %4 : vector<1x32xf32> to vector<16x32xf32>
    %186 = arith.mulf %184, %185 : vector<16x32xf32>
    %187 = vector.broadcast %5 : vector<1x32xf32> to vector<16x32xf32>
    %188 = arith.addf %186, %187 : vector<16x32xf32>
    %cst_61 = arith.constant dense<0.000000e+00> : vector<16x64xf32>
    %189 = tpu.matmul %188, %8, %cst_61 {dimension_numbers = #tpu.dot_dimension_numbers<[1], [0], [0], [1], [0, 0, 1, 1], [], []>} : vector<16x32xf32>, vector<32x64xf32>, vector<16x64xf32> -> vector<16x64xf32>
    %190 = vector.broadcast %9 : vector<1x64xf32> to vector<16x64xf32>
    %191 = arith.addf %189, %190 : vector<16x64xf32>
    %cst_62 = arith.constant 5.000000e-01 : f32
    %192 = vector.broadcast %cst_62 : f32 to vector<16x64xf32>
    %193 = arith.mulf %192, %191 : vector<16x64xf32>
    %cst_63 = arith.constant 0.707106769 : f32
    %194 = vector.broadcast %cst_63 : f32 to vector<16x64xf32>
    %195 = arith.mulf %191, %194 : vector<16x64xf32>
    %196 = math.erf %195 : vector<16x64xf32>
    %cst_64 = arith.constant 1.000000e+00 : f32
    %197 = vector.broadcast %cst_64 : f32 to vector<16x64xf32>
    %198 = arith.addf %197, %196 : vector<16x64xf32>
    %199 = arith.mulf %193, %198 : vector<16x64xf32>
    %cst_65 = arith.constant dense<0.000000e+00> : vector<16x32xf32>
    %200 = tpu.matmul %199, %10, %cst_65 {dimension_numbers = #tpu.dot_dimension_numbers<[1], [0], [0], [1], [0, 0, 1, 1], [], []>} : vector<16x64xf32>, vector<64x32xf32>, vector<16x32xf32> -> vector<16x32xf32>
    %201 = vector.broadcast %11 : vector<1x32xf32> to vector<16x32xf32>
    %202 = arith.addf %200, %201 : vector<16x32xf32>
    %203 = arith.addf %202, %166 : vector<16x32xf32>
    %c0_66 = arith.constant 0 : index
    %c0_67 = arith.constant 0 : index
    %204 = vector.load %arg13[%c0_66, %c0_67] : memref<16x32xf32, #tpu.memory_space<vmem>>, vector<16x32xf32>
    tpu.vector_store %arg13[%c0_66, %c0_67], %203 {strides = array<i32>} : memref<16x32xf32, #tpu.memory_space<vmem>>, vector<16x32xf32>,
    return
  }
  func.func @transform_0(%arg0: i32) -> (i32, i32) {
    %c0_i32 = arith.constant 0 : i32
    %c0_i32_0 = arith.constant 0 : i32
    %c0_i32_1 = arith.constant 0 : i32
    return %c0_i32, %c0_i32_0 : i32, i32
  }
  func.func @transform_1(%arg0: i32) -> (i32, i32) {
    %c0_i32 = arith.constant 0 : i32
    %c0_i32_0 = arith.constant 0 : i32
    %c0_i32_1 = arith.constant 0 : i32
    return %c0_i32, %c0_i32_0 : i32, i32
  }
  func.func @transform_2(%arg0: i32) -> (i32, i32) {
    %c0_i32 = arith.constant 0 : i32
    %c0_i32_0 = arith.constant 0 : i32
    %c0_i32_1 = arith.constant 0 : i32
    return %c0_i32, %c0_i32_0 : i32, i32
  }
  func.func @transform_3(%arg0: i32) -> (i32, i32) {
    %c0_i32 = arith.constant 0 : i32
    %c0_i32_0 = arith.constant 0 : i32
    %c0_i32_1 = arith.constant 0 : i32
    return %c0_i32, %c0_i32_0 : i32, i32
  }
  func.func @transform_4(%arg0: i32) -> (i32, i32, i32) {
    %c0_i32 = arith.constant 0 : i32
    %c0_i32_0 = arith.constant 0 : i32
    %c0_i32_1 = arith.constant 0 : i32
    %c0_i32_2 = arith.constant 0 : i32
    return %c0_i32, %c0_i32_0, %c0_i32_1 : i32, i32, i32
  }
  func.func @transform_5(%arg0: i32) -> (i32, i32, i32) {
    %c0_i32 = arith.constant 0 : i32
    %c0_i32_0 = arith.constant 0 : i32
    %c0_i32_1 = arith.constant 0 : i32
    %c0_i32_2 = arith.constant 0 : i32
    return %c0_i32, %c0_i32_0, %c0_i32_1 : i32, i32, i32
  }
  func.func @transform_6(%arg0: i32) -> (i32, i32) {
    %c0_i32 = arith.constant 0 : i32
    %c0_i32_0 = arith.constant 0 : i32
    %c0_i32_1 = arith.constant 0 : i32
    return %c0_i32, %c0_i32_0 : i32, i32
  }
  func.func @transform_7(%arg0: i32) -> (i32, i32) {
    %c0_i32 = arith.constant 0 : i32
    %c0_i32_0 = arith.constant 0 : i32
    %c0_i32_1 = arith.constant 0 : i32
    return %c0_i32, %c0_i32_0 : i32, i32
  }
  func.func @transform_8(%arg0: i32) -> (i32, i32) {
    %c0_i32 = arith.constant 0 : i32
    %c0_i32_0 = arith.constant 0 : i32
    %c0_i32_1 = arith.constant 0 : i32
    return %c0_i32, %c0_i32_0 : i32, i32
  }
  func.func @transform_9(%arg0: i32) -> (i32, i32) {
    %c0_i32 = arith.constant 0 : i32
    %c0_i32_0 = arith.constant 0 : i32
    %c0_i32_1 = arith.constant 0 : i32
    return %c0_i32, %c0_i32_0 : i32, i32
  }
  func.func @transform_10(%arg0: i32) -> (i32, i32) {
    %c0_i32 = arith.constant 0 : i32
    %c0_i32_0 = arith.constant 0 : i32
    %c0_i32_1 = arith.constant 0 : i32
    return %c0_i32, %c0_i32_0 : i32, i32
  }
  func.func @transform_11(%arg0: i32) -> (i32, i32) {
    %c0_i32 = arith.constant 0 : i32
    %c0_i32_0 = arith.constant 0 : i32
    %c0_i32_1 = arith.constant 0 : i32
    return %c0_i32, %c0_i32_0 : i32, i32
  }
  func.func @transform_12(%arg0: i32) -> (i32, i32) {
    %c0_i32 = arith.constant 0 : i32
    %c0_i32_0 = arith.constant 0 : i32
    %c0_i32_1 = arith.constant 0 : i32
    return %c0_i32, %c0_i32_0 : i32, i32
  }
}

</mosaic_0001>

<bundles_post_ra>
// kernel: transformer_forward.1
= control target key start
LH: loop header
LB: loop body
LE: loop exit
PB: predicated region body
PF: predicated region fallthrough
CT: control target
= control target key end

     0   :  { %vm112_vm0 = vcmask 261120   ;;  %s6014_s0 = inlined_call_operand.vmem [shape: f32[16,32], index: 0, kind: input, shape index: {}]   ;;  %s6015_s1 = inlined_call_operand.vmem [shape: f32[16,16], index: 1, kind: input, shape index: {}]   ;;  %s6016_s2 = inlined_call_operand.vmem [shape: f32[1,32], index: 2, kind: input, shape index: {}]   ;;  %s6017_s3 = inlined_call_operand.vmem [shape: f32[1,32], index: 3, kind: input, shape index: {}]   ;;  %s6018_s4 = inlined_call_operand.vmem [shape: f32[8,32,8], index: 4, kind: input, shape index: {}]   ;;  %s6019_s5 = inlined_call_operand.vmem [shape: f32[4,32,32], index: 5, kind: input, shape index: {}]   ;;  %s6020_s6 = inlined_call_operand.vmem [shape: f32[1,32], index: 6, kind: input, shape index: {}]   ;;  %s6021_s7 = inlined_call_operand.vmem [shape: f32[1,32], index: 7, kind: input, shape index: {}]   ;;  %s6022_s8 = inlined_call_operand.vmem [shape: f32[32,64], index: 8, kind: input, shape index: {}]   ;;  %s6023_s9 = inlined_call_operand.vmem [shape: f32[1,64], index: 9, kind: input, shape index: {}]   ;;  %s6024_s10 = inlined_call_operand.vmem [shape: f32[64,32], index: 10, kind: input, shape index: {}]   ;;  %s6025_s11 = inlined_call_operand.vmem [shape: f32[1,32], index: 11, kind: input, shape index: {}]   ;;  %s6026_s12 = inlined_call_operand.hbm [shape: f32[16,32], index: 12, kind: output, shape index: {}]  }
   0x1   :  { %v5291_v0 = vld [vmem:[%s6014_s0] sm:$0xff]  ;;  %v5296_v1 = vld [vmem:[%s6014_s0 + $0x8] sm:$0xff] }
   0x2   :  { %17 = vsyncpa [#allocation3], 0  ;;  %v113_v2 = vsel %vm112_vm0, %v5291_v0, 0.0  ;;  %v116_v3 = vsel %vm112_vm0, %v5296_v1, 0.0  ;;  %v50_v14 = vld [vmem:[%s6018_s4] sm:$0xff]  ;;  %v51_v15 = vld [vmem:[%s6018_s4 + $0x8] sm:$0xff] }
   0x3   :  { %114 = vadd.xlane.f32.xlu0 %v113_v2  ;;  %v58_v16 = vld [vmem:[%s6018_s4 + $0x40] sm:$0xff]  ;;  %v5315_v17 = vpack.c.bf16 %v51_v15, %v50_v14  ;;  %v59_v18 = vld [vmem:[%s6018_s4 + $0x48] sm:$0xff]  ;;  %v52_v20 = vld [vmem:[%s6018_s4 + $0x10] sm:$0xff]  ;;  %vm1062_vm1 = vcmask 64512   ;;  %vm1411_vm3 = vcmask 130048   ;;  %vm1977_vm4 = vcmask 523264  }
   0x4   :  { %v5320_v19 = vpack.c.bf16 %v59_v18, %v58_v16  ;;  %v53_v21 = vld [vmem:[%s6018_s4 + $0x18] sm:$0xff]  ;;  %v60_v22 = vld [vmem:[%s6018_s4 + $0x50] sm:$0xff]  ;;  %v54_v26 = vld [vmem:[%s6018_s4 + $0x20] sm:$0xff] }
   0x5   :  { %4774 = vmatprep.subr.bf16.mxu1 %v5315_v17  ;;  %v5335_v23 = vpack.c.bf16 %v53_v21, %v52_v20  ;;  %v61_v24 = vld [vmem:[%s6018_s4 + $0x58] sm:$0xff]  ;;  %v55_v27 = vld [vmem:[%s6018_s4 + $0x28] sm:$0xff]  ;;  %v66_v28 = vld [vmem:[%s6018_s4 + $0x80] sm:$0xff] }
   0x6   :  { %4790 = vmatprep.subr.bf16.mxu0 %v5320_v19  ;;  %4776 = vmatpush3.bf16.msra.mxu1 %v5315_v17  ;;  %v5340_v25 = vpack.c.bf16 %v61_v24, %v60_v22  ;;  %v5355_v29 = vpack.c.bf16 %v55_v27, %v54_v26  ;;  %v67_v30 = vld [vmem:[%s6018_s4 + $0x88] sm:$0xff]  ;;  %v5367_v39 = vld [vmem:[%s6016_s2] ss:$0 sm:$0xff]  ;;  %v56_v46 = vld [vmem:[%s6018_s4 + $0x30] sm:$0xff] }
   0x7   :  { %117 = vadd.xlane.f32.xlu0 %v116_v3  ;;  %4792 = vmatpush3.bf16.msra.mxu0 %v5320_v19  ;;  %v5360_v31 = vpack.c.bf16 %v67_v30, %v66_v28  ;;  %v5372_v41 = vld [vmem:[%s6017_s3] ss:$0 sm:$0xff]  ;;  %v57_v48 = vld [vmem:[%s6018_s4 + $0x38] sm:$0xff]  ;;  %v68_v49 = vld [vmem:[%s6018_s4 + $0x90] sm:$0xff] }
   0x8   :  { %4778 = vmatprep.subr.bf16.mxu1 %v5335_v23  ;;  %4794 = vmatprep.subr.bf16.mxu0 %v5340_v25  ;;  %v69_v50 = vld [vmem:[%s6018_s4 + $0x98] sm:$0xff]  ;;  %v62_v52 = vld [vmem:[%s6018_s4 + $0x60] sm:$0xff]  ;;  %v5401_v53 = vpack.c.bf16 %v57_v48, %v56_v46  ;;  %v63_v55 = vld [vmem:[%s6018_s4 + $0x68] sm:$0xff] }
   0x9   :  { %v5403_v54 = vpack.c.bf16 %v69_v50, %v68_v49  ;;  %v74_v56 = vld [vmem:[%s6018_s4 + $0xc0] sm:$0xff]  ;;  %v75_v57 = vld [vmem:[%s6018_s4 + $0xc8] sm:$0xff]  ;;  %v5424_v58 = vpack.c.bf16 %v63_v55, %v62_v52  ;;  %v64_v60 = vld [vmem:[%s6018_s4 + $0x70] sm:$0xff] }
   0xa   :  { %4780 = vmatpush3.bf16.msra.mxu1 %v5335_v23  ;;  %v5426_v59 = vpack.c.bf16 %v75_v57, %v74_v56  ;;  %v65_v61 = vld [vmem:[%s6018_s4 + $0x78] sm:$0xff]  ;;  %v76_v62 = vld [vmem:[%s6018_s4 + $0xd0] sm:$0xff]  ;;  %v78_v15 = vld [vmem:[%s6018_s4 + $0xe0] sm:$0xff] }
   0xb   :  { %4796 = vmatpush3.bf16.msra.mxu0 %v5340_v25  ;;  %4782 = vmatprep.subr.bf16.mxu1 %v5355_v29  ;;  %v77_v63 = vld [vmem:[%s6018_s4 + $0xd8] sm:$0xff]  ;;  %v5446_v2 = vpack.c.bf16 %v65_v61, %v64_v60  ;;  %v79_v16 = vld [vmem:[%s6018_s4 + $0xe8] sm:$0xff]  ;;  %v90_v20 = vld [vmem:[%s6019_s5 + $0x40] sm:$0xff] }
   0xc   :  { %4806 = vmatprep.subr.bf16.mxu0 %v5360_v31  ;;  %v5448_v3 = vpack.c.bf16 %v77_v63, %v76_v62  ;;  %v91_v21 = vld [vmem:[%s6019_s5 + $0x48] sm:$0xff]  ;;  %v5518_v22 = vpack.c.bf16 %v79_v16, %v78_v15  ;;  %v80_v26 = vld [vmem:[%s6018_s4 + $0xf0] sm:$0xff]  ;;  %v81_v27 = vld [vmem:[%s6018_s4 + $0xf8] sm:$0xff] }
   0xd   :  { %v5523_v24 = vpack.c.bf16 %v91_v21, %v90_v20  ;;  %v92_v28 = vld [vmem:[%s6019_s5 + $0x50] sm:$0xff]  ;;  %v93_v30 = vld [vmem:[%s6019_s5 + $0x58] sm:$0xff]  ;;  %vm5615_vm2 = vmpackc.low %vm1062_vm1, %vm1062_vm1 }
   0xe   :  { %v96_v46 = vld [vmem:[%s6019_s5 + $0x70] sm:$0xff] }
  0x90   :  { %v115_v4 = vpop.xlane.xlu0 %114 }
  0x91   :  { %v120_v5 = vmul.f32 0.03125, %v115_v4  ;;  %v70_v4 = vld [vmem:[%s6018_s4 + $0xa0] sm:$0xff] }
  0x93   :  { %v122_v6 = vsub.f32 %v5291_v0, %v120_v5  ;;  %v71_v5 = vld [vmem:[%s6018_s4 + $0xa8] sm:$0xff] }
  0x94   :  { %v118_v7 = vpop.xlane.xlu0 %117 }
  0x95   :  { %v121_v8 = vmul.f32 0.03125, %v118_v7  ;;  %v124_v9 = vmul.f32 %v122_v6, %v122_v6  ;;  %v83_v7 = vld [vmem:[%s6019_s5 + $0x8] sm:$0xff] }
  0x97   :  { %v123_v10 = vsub.f32 %v5296_v1, %v121_v8  ;;  %v126_v11 = vsel %vm112_vm0, %v124_v9, 0.0  ;;  %v5472_v8 = vpack.c.bf16 %v71_v5, %v70_v4 }
  0x98   :  { %127 = vadd.xlane.f32.xlu1 %v126_v11  ;;  %v73_v11 = vld [vmem:[%s6018_s4 + $0xb8] sm:$0xff] }
  0x99   :  { %v125_v12 = vmul.f32 %v123_v10, %v123_v10 }
  0x9b   :  { %v129_v13 = vsel %vm112_vm0, %v125_v12, 0.0  ;;  %v84_v12 = vld [vmem:[%s6019_s5 + $0x10] sm:$0xff] }
  0x9c   :  { %130 = vadd.xlane.f32.xlu1 %v129_v13  ;;  %v85_v13 = vld [vmem:[%s6019_s5 + $0x18] sm:$0xff] }
  0x9d   :  { %v5504_v18 = vpack.c.bf16 %v85_v13, %v84_v12 }
 0x125   :  { %v128_v32 = vpop.xlane.xlu1 %127 }
 0x126   :  { %v132_v33 = vmul.f32 0.03125, %v128_v32  ;;  %v5542_v32 = vpack.c.bf16 %v81_v27, %v80_v26 }
 0x128   :  { %v134_v34 = vadd.f32 1e-05, %v132_v33  ;;  %v86_v33 = vld [vmem:[%s6019_s5 + $0x20] sm:$0xff] }
 0x129   :  { %v131_v35 = vpop.xlane.xlu1 %130 }
 0x12a   :  { %5108 = vrsqrt.f32 %v134_v34  ;;  %v133_v36 = vmul.f32 0.03125, %v131_v35  ;;  %v87_v34 = vld [vmem:[%s6019_s5 + $0x28] sm:$0xff]  ;;  %v5552_v35 = vpack.c.bf16 %v93_v30, %v92_v28 }
 0x12c   :  { %v135_v37 = vadd.f32 1e-05, %v133_v36  ;;  %v5560_v36 = vpack.c.bf16 %v87_v34, %v86_v33 }
 0x12e   :  { %5110 = vrsqrt.f32 %v135_v37  ;;  %v88_v37 = vld [vmem:[%s6019_s5 + $0x30] sm:$0xff] }
 0x134   :  { %v5109_v38 = vpop.eup %5108 }
 0x135   :  { %v138_v40 = vmul.f32 %v5109_v38, %v122_v6  ;;  %v82_v6 = vld [vmem:[%s6019_s5] sm:$0xff]  ;;  %v89_v38 = vld [vmem:[%s6019_s5 + $0x38] sm:$0xff] }
 0x136   :  { %v5476_v9 = vpack.c.bf16 %v83_v7, %v82_v6 }
 0x137   :  { %v146_v42 = vmul.f32 %v5367_v39, %v138_v40  ;;  %v5575_v40 = vpack.c.bf16 %v89_v38, %v88_v37 }
 0x138   :  { %v5111_v43 = vpop.eup %5110 }
 0x139   :  { %v5376_v44 = vadd.f32 %v5372_v41, %v146_v42  ;;  %v139_v45 = vmul.f32 %v5111_v43, %v123_v10  ;;  %v72_v10 = vld [vmem:[%s6018_s4 + $0xb0] sm:$0xff]  ;;  %v94_v42 = vld [vmem:[%s6019_s5 + $0x60] sm:$0xff]  ;;  %v95_v43 = vld [vmem:[%s6019_s5 + $0x68] sm:$0xff] }
 0x13a   :  { %v5494_v14 = vpack.c.bf16 %v73_v11, %v72_v10 }
 0x13b   :  { %v147_v47 = vmul.f32 %v5367_v39, %v139_v45  ;;  %4345 = vmatprep.mubr.msk.f32.mxu1 %vm112_vm0, %v5376_v44  ;;  %4367 = vmatprep.mubr.msk.f32.mxu0 %vm112_vm0, %v5376_v44  ;;  %v5591_v45 = vpack.c.bf16 %v95_v43, %v94_v42  ;;  %v5652_v43 = vld [vmem:[%s6015_s1 + $0x8] sm:$0xff] }
 0x13d   :  { %v5396_v51 = vadd.f32 %v5372_v41, %v147_v47  ;;  %v97_v47 = vld [vmem:[%s6019_s5 + $0x78] sm:$0xff] }
 0x13e   :  { %v5601_v48 = vpack.c.bf16 %v97_v47, %v96_v46  ;;  %v5657_v46 = vld [vmem:[%s6015_s1] sm:$0xff] }
 0x13f   :  { %4346 = vmatmul.mubr.msk.f32.vlgmr.msra.gmra.mrb[0].mxu1 %vm112_vm0, %v5396_v51  ;;  %4368 = vmatmul.mubr.msk.f32.vlgmr.msra.gmra.mrb[0].mxu0 %vm112_vm0, %v5396_v51 }
 0x140   :  { %4784 = vmatpush3.bf16.msra.mxu1 %v5355_v29  ;;  %4808 = vmatpush3.bf16.msra.mxu0 %v5360_v31 }
 0x141   :  { %4356 = vmatprep.mubr.msk.f32.mxu1 %vm112_vm0, %v5376_v44  ;;  %4389 = vmatprep.mubr.msk.f32.mxu0 %vm112_vm0, %v5376_v44 }
 0x142   :  { %4786 = vmatprep.subr.bf16.mxu1 %v5401_v53  ;;  %4810 = vmatprep.subr.bf16.mxu0 %v5403_v54 }
 0x144   :  { %4788 = vmatpush3.bf16.msra.mxu1 %v5401_v53  ;;  %4812 = vmatpush3.bf16.msra.mxu0 %v5403_v54 }
 0x145   :  { %4798 = vmatprep.subr.bf16.mxu1 %v5424_v58  ;;  %4822 = vmatprep.subr.bf16.mxu0 %v5426_v59 }
 0x147   :  { %4357 = vmatmul.mubr.msk.f32.vlgmr.msra.gmra.mrb[2].mxu1 %vm112_vm0, %v5396_v51  ;;  %4390 = vmatmul.mubr.msk.f32.vlgmr.msra.gmra.mrb[2].mxu0 %vm112_vm0, %v5396_v51 }
 0x148   :  { %4800 = vmatpush3.bf16.msra.mxu1 %v5424_v58  ;;  %4378 = vmatprep.mubr.msk.f32.mxu1 %vm112_vm0, %v5376_v44 }
 0x149   :  { %4824 = vmatpush3.bf16.msra.mxu0 %v5426_v59  ;;  %4411 = vmatprep.mubr.msk.f32.mxu0 %vm112_vm0, %v5376_v44 }
 0x14a   :  { %4802 = vmatprep.subr.bf16.mxu1 %v5446_v2  ;;  %4826 = vmatprep.subr.bf16.mxu0 %v5448_v3 }
 0x14c   :  { %4804 = vmatpush3.bf16.msra.mxu1 %v5446_v2 }
 0x14d   :  { %4828 = vmatpush3.bf16.msra.mxu0 %v5448_v3  ;;  %4814 = vmatprep.subr.bf16.mxu1 %v5472_v8 }
 0x14e   :  { %4838 = vmatprep.subr.bf16.mxu0 %v5476_v9 }
 0x14f   :  { %4379 = vmatmul.mubr.msk.f32.vlgmr.msra.gmra.mrb[4].mxu1 %vm112_vm0, %v5396_v51 }
 0x150   :  { %4412 = vmatmul.mubr.msk.f32.vlgmr.msra.gmra.mrb[4].mxu0 %vm112_vm0, %v5396_v51  ;;  %4816 = vmatpush3.bf16.msra.mxu1 %v5472_v8 }
 0x151   :  { %4400 = vmatprep.mubr.msk.f32.mxu1 %vm112_vm0, %v5376_v44  ;;  %4840 = vmatpush3.bf16.msra.mxu0 %v5476_v9 }
 0x152   :  { %4433 = vmatprep.mubr.msk.f32.mxu0 %vm112_vm0, %v5376_v44  ;;  %4818 = vmatprep.subr.bf16.mxu1 %v5494_v14 }
 0x153   :  { %4842 = vmatprep.subr.bf16.mxu0 %v5504_v18 }
 0x154   :  { %4820 = vmatpush3.bf16.msra.mxu1 %v5494_v14 }
 0x155   :  { %4844 = vmatpush3.bf16.msra.mxu0 %v5504_v18  ;;  %4830 = vmatprep.subr.bf16.mxu1 %v5518_v22 }
 0x156   :  { %4854 = vmatprep.subr.bf16.mxu0 %v5523_v24 }
 0x157   :  { %4401 = vmatmul.mubr.msk.f32.vlgmr.msra.gmra.mrb[6].mxu1 %vm112_vm0, %v5396_v51 }
 0x158   :  { %4434 = vmatmul.mubr.msk.f32.vlgmr.msra.gmra.mrb[6].mxu0 %vm112_vm0, %v5396_v51  ;;  %4832 = vmatpush3.bf16.msra.mxu1 %v5518_v22 }
 0x159   :  { %4422 = vmatprep.mubr.msk.f32.mxu1 %vm112_vm0, %v5376_v44  ;;  %4856 = vmatpush3.bf16.msra.mxu0 %v5523_v24 }
 0x15a   :  { %4455 = vmatprep.mubr.msk.f32.mxu0 %vm112_vm0, %v5376_v44  ;;  %4834 = vmatprep.subr.bf16.mxu1 %v5542_v32 }
 0x15b   :  { %4858 = vmatprep.subr.bf16.mxu0 %v5552_v35 }
 0x15c   :  { %4836 = vmatpush3.bf16.msra.mxu1 %v5542_v32 }
 0x15d   :  { %4860 = vmatpush3.bf16.msra.mxu0 %v5552_v35  ;;  %4846 = vmatprep.subr.bf16.mxu1 %v5560_v36 }
 0x15f   :  { %4423 = vmatmul.mubr.msk.f32.vlgmr.msra.gmra.mrb[8].mxu1 %vm112_vm0, %v5396_v51 }
 0x160   :  { %4456 = vmatmul.mubr.msk.f32.vlgmr.msra.gmra.mrb[8].mxu0 %vm112_vm0, %v5396_v51  ;;  %4848 = vmatpush3.bf16.msra.mxu1 %v5560_v36 }
 0x161   :  { %4444 = vmatprep.mubr.msk.f32.mxu1 %vm112_vm0, %v5376_v44  ;;  %4850 = vmatprep.subr.bf16.mxu1 %v5575_v40 }
 0x164   :  { %4852 = vmatpush3.bf16.msra.mxu1 %v5575_v40 }
 0x165   :  { %4862 = vmatprep.subr.bf16.mxu1 %v5591_v45 }
 0x167   :  { %4445 = vmatmul.mubr.msk.f32.vlgmr.msra.gmra.mrb[10].mxu1 %vm112_vm0, %v5396_v51 }
 0x168   :  { %4864 = vmatpush3.bf16.msra.mxu1 %v5591_v45  ;;  %4466 = vmatprep.mubr.msk.f32.mxu1 %vm112_vm0, %v5376_v44 }
 0x169   :  { %4866 = vmatprep.subr.bf16.mxu1 %v5601_v48 }
 0x16c   :  { %4868 = vmatpush3.bf16.msra.mxu1 %v5601_v48 }
 0x16f   :  { %4467 = vmatmul.mubr.msk.f32.vlgmr.msra.gmra.mrb[12].mxu1 %vm112_vm0, %v5396_v51 }
 0x212   :  { %v4347_v49 = vpop.f32.mrb[0].mxu1  ;;  %v4369_v50 = vpop.f32.mrb[0].mxu0 }
 0x213   :  { %v228_v52 = vpop.f32.mrb[1].mxu1  ;;  %v378_v55 = vpop.f32.mrb[1].mxu0 }
 0x214   :  { %4473 = vmatprep.mubr.msk.f32.mxu0 %vm1062_vm1, %v228_v52 }
 0x21a   :  { %v4358_v56 = vpop.f32.mrb[2].mxu1  ;;  %v4391_v57 = vpop.f32.mrb[2].mxu0 }
 0x21b   :  { %v303_v60 = vpop.f32.mrb[3].mxu1  ;;  %v528_v61 = vpop.f32.mrb[3].mxu0 }
 0x21c   :  { %v4869_v62 = vpack.c.bf16 %v4391_v57, %v528_v61  ;;  %4480 = vmatprep.mubr.msk.f32.mxu1 %vm1062_vm1, %v303_v60 }
 0x21e   :  { %4871 = vmatprep.subr.msk.bf16.mxu0 %vm5615_vm2, %v4869_v62 }
 0x21f   :  { %4874 = vmatpush3.bf16.xpose.msk.msra.mxu0 %vm5615_vm2, %v4869_v62 }
 0x222   :  { %v4380_v51 = vpop.f32.mrb[4].mxu1 }
 0x223   :  { %v4413_v63 = vpop.f32.mrb[4].mxu0  ;;  %v453_v4 = vpop.f32.mrb[5].mxu1 }
 0x224   :  { %v678_v5 = vpop.f32.mrb[5].mxu0 }
 0x225   :  { %v4881_v6 = vpack.c.bf16 %v4413_v63, %v678_v5 }
 0x226   :  { %4474 = vmatmul.mubr.msk.f32.vlgmr.msra.gmra.mrb[10].mxu0 %vm1062_vm1, %v4347_v49 }
 0x227   :  { %4883 = vmatprep.subr.msk.bf16.mxu0 %vm5615_vm2, %v4881_v6  ;;  %4487 = vmatprep.mubr.msk.f32.mxu0 %vm1062_vm1, %v378_v55 }
 0x228   :  { %4886 = vmatpush3.bf16.xpose.msk.msra.mxu0 %vm5615_vm2, %v4881_v6 }
 0x22a   :  { %v4402_v7 = vpop.f32.mrb[6].mxu1 }
 0x22b   :  { %v4435_v10 = vpop.f32.mrb[6].mxu0  ;;  %v603_v11 = vpop.f32.mrb[7].mxu1 }
 0x22c   :  { %v4875_v12 = vpack.c.bf16 %v4402_v7, %v603_v11  ;;  %v828_v13 = vpop.f32.mrb[7].mxu0 }
 0x22d   :  { %v4893_v15 = vpack.c.bf16 %v4435_v10, %v828_v13 }
 0x22e   :  { %4877 = vmatprep.subr.msk.bf16.mxu1 %vm5615_vm2, %v4875_v12 }
 0x22f   :  { %4488 = vmatmul.mubr.msk.f32.vlgmr.msra.gmra.mrb[12].mxu0 %vm1062_vm1, %v4369_v50  ;;  %4894 = vmatprep.subr.bf16.mxu0 %v4893_v15 }
 0x230   :  { %4880 = vmatpush3.bf16.xpose.msk.msra.mxu1 %vm5615_vm2, %v4875_v12  ;;  %4896 = vmatpush3.bf16.msra.mxu0 %v4893_v15 }
 0x232   :  { %v4424_v16 = vpop.f32.mrb[8].mxu1 }
 0x233   :  { %v4457_v20 = vpop.f32.mrb[8].mxu0  ;;  %v753_v21 = vpop.f32.mrb[9].mxu1 }
 0x234   :  { %v4887_v26 = vpack.c.bf16 %v4424_v16, %v753_v21  ;;  %v978_v27 = vpop.f32.mrb[9].mxu0 }
 0x235   :  { %v5635_v28 = vpack.c.bf16 %v4457_v20, %v978_v27 }
 0x236   :  { %4889 = vmatprep.subr.msk.bf16.mxu1 %vm5615_vm2, %v4887_v26 }
 0x237   :  { %4481 = vmatmul.mubr.msk.f32.vlgmr.msra.gmra.mrb[14].mxu1 %vm1062_vm1, %v4358_v56 }
 0x238   :  { %4892 = vmatpush3.bf16.xpose.msk.msra.mxu1 %vm5615_vm2, %v4887_v26  ;;  %4494 = vmatprep.mubr.msk.f32.mxu1 %vm1062_vm1, %v453_v4 }
 0x23a   :  { %v4446_v30 = vpop.f32.mrb[10].mxu1 }
 0x23b   :  { %v903_v33 = vpop.f32.mrb[11].mxu1 }
 0x23c   :  { %v5643_v34 = vpack.c.bf16 %v4446_v30, %v903_v33 }
 0x23e   :  { %4898 = vmatprep.subr.bf16.mxu0 %v5643_v34 }
 0x23f   :  { %4495 = vmatmul.mubr.msk.f32.vlgmr.msra.gmra.mrb[16].mxu1 %vm1062_vm1, %v4380_v51 }
 0x242   :  { %v4468_v37 = vpop.f32.mrb[12].mxu1 }
 0x243   :  { %v1053_v38 = vpop.f32.mrb[13].mxu1 }
 0x244   :  { %v5647_v42 = vpack.c.bf16 %v4468_v37, %v1053_v38 }
 0x2f9   :  { %v4475_v47 = vpop.f32.mrb[10].mxu0 }
 0x2fa   :  { %v1147_v49 = vadd.f32 %v4475_v47, %v5652_v43  ;;  %v1141_v50 = vpop.f32.mrb[11].mxu0 }
 0x2fb   :  { %v1142_v52 = vadd.f32 %v1141_v50, %v5657_v46 }
 0x2fc   :  { %v1415_v55 = vsel %vm1411_vm3, %v1147_v49, -inf }
 0x2fd   :  { %1416 = vmax.xlane.f32.xlu1 %v1415_v55  ;;  %v1412_v56 = vsel %vm1411_vm3, %v1142_v52, -inf }
 0x2fe   :  { %1413 = vmax.xlane.f32.xlu0 %v1412_v56 }
 0x302   :  { %v4489_v57 = vpop.f32.mrb[12].mxu0 }
 0x303   :  { %v1315_v60 = vpop.f32.mrb[13].mxu0  ;;  %v1321_v4 = vadd.f32 %v4489_v57, %v5652_v43 }
 0x304   :  { %v1316_v6 = vadd.f32 %v1315_v60, %v5657_v46 }
 0x305   :  { %v1427_v10 = vsel %vm1411_vm3, %v1321_v4, -inf }
 0x306   :  { %v1424_v12 = vsel %vm1411_vm3, %v1316_v6, -inf }
 0x30a   :  { %v4482_v61 = vpop.f32.mrb[14].mxu1 }
 0x30b   :  { %v1234_v62 = vadd.f32 %v4482_v61, %v5652_v43  ;;  %v1228_v51 = vpop.f32.mrb[15].mxu1 }
 0x30c   :  { %v1229_v63 = vadd.f32 %v1228_v51, %v5657_v46 }
 0x30d   :  { %v1421_v5 = vsel %vm1411_vm3, %v1234_v62, -inf }
 0x30e   :  { %1422 = vmax.xlane.f32.xlu1 %v1421_v5  ;;  %v1418_v7 = vsel %vm1411_vm3, %v1229_v63, -inf }
 0x30f   :  { %1419 = vmax.xlane.f32.xlu0 %v1418_v7 }
 0x312   :  { %1428 = vmax.xlane.f32.xlu1 %v1427_v10  ;;  %v4496_v11 = vpop.f32.mrb[16].mxu1 }
 0x313   :  { %v1408_v13 = vadd.f32 %v4496_v11, %v5652_v43  ;;  %v1402_v15 = vpop.f32.mrb[17].mxu1  ;;  %1425 = vmax.xlane.f32.xlu0 %v1424_v12 }
 0x314   :  { %v1403_v16 = vadd.f32 %v1402_v15, %v5657_v46 }
 0x315   :  { %v1433_v20 = vsel %vm1411_vm3, %v1408_v13, -inf }
 0x316   :  { %1434 = vmax.xlane.f32.xlu1 %v1433_v20  ;;  %v1430_v21 = vsel %vm1411_vm3, %v1403_v16, -inf }
 0x317   :  { %1431 = vmax.xlane.f32.xlu0 %v1430_v21 }
 0x38a   :  { %v1417_v26 = vpop.xlane.xlu1 %1416 }
 0x38b   :  { %v1437_v27 = vsub.f32 %v1147_v49, %v1417_v26  ;;  %v1414_v30 = vpop.xlane.xlu0 %1413 }
 0x38c   :  { %v1436_v33 = vsub.f32 %v1142_v52, %v1414_v30 }
 0x38d   :  { %v1446_v37 = vmul.f32 1.442695, %v1437_v27 }
 0x38e   :  { %v1444_v38 = vmul.f32 1.442695, %v1436_v33 }
 0x38f   :  { %5112 = vpow2.f32 %v1446_v37 }
 0x390   :  { %5114 = vpow2.f32 %v1444_v38 }
 0x399   :  { %v5113_v47 = vpop.eup %5112 }
 0x39a   :  { %v5115_v50 = vpop.eup %5114  ;;  %v1463_v55 = vsel %vm1411_vm3, %v5113_v47, 0.0 }
 0x39b   :  { %v1423_v56 = vpop.xlane.xlu1 %1422  ;;  %1464 = vadd.xlane.f32.xlu1 %v1463_v55  ;;  %v1460_v57 = vsel %vm1411_vm3, %v5115_v50, 0.0 }
 0x39c   :  { %v1439_v60 = vsub.f32 %v1234_v62, %v1423_v56  ;;  %v1420_v61 = vpop.xlane.xlu0 %1419  ;;  %1461 = vadd.xlane.f32.xlu0 %v1460_v57 }
 0x39d   :  { %v1438_v51 = vsub.f32 %v1229_v63, %v1420_v61 }
 0x39e   :  { %v1450_v5 = vmul.f32 1.442695, %v1439_v60 }
 0x39f   :  { %v1448_v49 = vmul.f32 1.442695, %v1438_v51  ;;  %v1429_v7 = vpop.xlane.xlu1 %1428 }
 0x3a0   :  { %5116 = vpow2.f32 %v1450_v5  ;;  %v1441_v52 = vsub.f32 %v1321_v4, %v1429_v7  ;;  %v1426_v10 = vpop.xlane.xlu0 %1425 }
 0x3a1   :  { %5118 = vpow2.f32 %v1448_v49  ;;  %v1440_v11 = vsub.f32 %v1316_v6, %v1426_v10 }
 0x3a2   :  { %v1454_v12 = vmul.f32 1.442695, %v1441_v52 }
 0x3a3   :  { %v1452_v15 = vmul.f32 1.442695, %v1440_v11  ;;  %v1435_v20 = vpop.xlane.xlu1 %1434 }
 0x3a4   :  { %5120 = vpow2.f32 %v1454_v12  ;;  %v1443_v21 = vsub.f32 %v1408_v13, %v1435_v20  ;;  %v1432_v26 = vpop.xlane.xlu0 %1431 }
 0x3a5   :  { %5122 = vpow2.f32 %v1452_v15  ;;  %v1442_v27 = vsub.f32 %v1403_v16, %v1432_v26 }
 0x3a6   :  { %v1458_v62 = vmul.f32 1.442695, %v1443_v21 }
 0x3a7   :  { %v1456_v30 = vmul.f32 1.442695, %v1442_v27 }
 0x3a8   :  { %5124 = vpow2.f32 %v1458_v62 }
 0x3a9   :  { %5126 = vpow2.f32 %v1456_v30 }
 0x3aa   :  { %v5117_v63 = vpop.eup %5116 }
 0x3ab   :  { %v5119_v33 = vpop.eup %5118  ;;  %v1469_v37 = vsel %vm1411_vm3, %v5117_v63, 0.0 }
 0x3ac   :  { %1470 = vadd.xlane.f32.xlu1 %v1469_v37  ;;  %v1466_v4 = vsel %vm1411_vm3, %v5119_v33, 0.0 }
 0x3ad   :  { %1467 = vadd.xlane.f32.xlu0 %v1466_v4 }
 0x3ae   :  { %v5121_v6 = vpop.eup %5120 }
 0x3af   :  { %v5123_v38 = vpop.eup %5122  ;;  %v1475_v55 = vsel %vm1411_vm3, %v5121_v6, 0.0 }
 0x3b0   :  { %1476 = vadd.xlane.f32.xlu1 %v1475_v55  ;;  %v1472_v13 = vsel %vm1411_vm3, %v5123_v38, 0.0 }
 0x3b1   :  { %1473 = vadd.xlane.f32.xlu0 %v1472_v13 }
 0x3b2   :  { %v5125_v16 = vpop.eup %5124 }
 0x3b3   :  { %v5127_v56 = vpop.eup %5126  ;;  %v1481_v57 = vsel %vm1411_vm3, %v5125_v16, 0.0 }
 0x3b4   :  { %1482 = vadd.xlane.f32.xlu1 %v1481_v57  ;;  %v1478_v60 = vsel %vm1411_vm3, %v5127_v56, 0.0 }
 0x3b5   :  { %1479 = vadd.xlane.f32.xlu0 %v1478_v60 }
 0x428   :  { %v1465_v61 = vpop.xlane.xlu1 %1464 }
 0x429   :  { %5128 = vrcp.f32 %v1465_v61  ;;  %v1462_v51 = vpop.xlane.xlu0 %1461 }
 0x42a   :  { %5130 = vrcp.f32 %v1462_v51 }
 0x433   :  { %v5129_v5 = vpop.eup %5128 }
 0x434   :  { %v5131_v49 = vpop.eup %5130  ;;  %v1493_v52 = vmul.f32 %v5129_v5, %v5113_v47 }
 0x435   :  { %v1492_v7 = vmul.f32 %v5131_v49, %v5115_v50  ;;  %v98_v49 = vld [vmem:[%s6022_s8] sm:$0xff] }
 0x437   :  { %4501 = vmatprep.mubr.msk.f32.mxu0 %vm1411_vm3, %v1492_v7  ;;  %v99_v7 = vld [vmem:[%s6022_s8 + $0x8] sm:$0xff] }
 0x438   :  { %4502 = vmatmul.mubr.msk.f32.vlgmr.msra.gmra.mrb[14].mxu0 %vm1411_vm3, %v1493_v52  ;;  %v5721_v52 = vpack.c.bf16 %v99_v7, %v98_v49 }
 0x439   :  { %v1471_v10 = vpop.xlane.xlu1 %1470  ;;  %4900 = vmatpush3.bf16.msra.mxu0 %v5643_v34 }
 0x43a   :  { %5132 = vrcp.f32 %v1471_v10  ;;  %4902 = vmatprep.subr.bf16.mxu0 %v5635_v28  ;;  %v1468_v11 = vpop.xlane.xlu0 %1467  ;;  %v100_v10 = vld [vmem:[%s6022_s8 + $0x10] sm:$0xff]  ;;  %4910 = vmatprep.subr.bf16.mxu1 %v5721_v52 }
 0x43b   :  { %5134 = vrcp.f32 %v1468_v11  ;;  %v101_v11 = vld [vmem:[%s6022_s8 + $0x18] sm:$0xff]  ;;  %4912 = vmatpush3.bf16.msra.mxu1 %v5721_v52 }
 0x43d   :  { %v1477_v15 = vpop.xlane.xlu1 %1476 }
 0x43e   :  { %v1474_v12 = vpop.xlane.xlu0 %1473 }
 0x43f   :  { %5136 = vrcp.f32 %v1474_v12  ;;  %v5730_v12 = vpack.c.bf16 %v101_v11, %v100_v10 }
 0x440   :  { %5138 = vrcp.f32 %v1477_v15 }
 0x441   :  { %v1483_v27 = vpop.xlane.xlu1 %1482  ;;  %4914 = vmatprep.subr.bf16.mxu1 %v5730_v12 }
 0x442   :  { %v1480_v20 = vpop.xlane.xlu0 %1479  ;;  %4916 = vmatpush3.bf16.msra.mxu1 %v5730_v12 }
 0x443   :  { %5140 = vrcp.f32 %v1480_v20 }
 0x444   :  { %v5133_v50 = vpop.eup %5132  ;;  %5142 = vrcp.f32 %v1483_v27 }
 0x445   :  { %v5135_v47 = vpop.eup %5134  ;;  %v1495_v26 = vmul.f32 %v5133_v50, %v5117_v63 }
 0x446   :  { %v1494_v21 = vmul.f32 %v5135_v47, %v5119_v33 }
 0x448   :  { %4508 = vmatprep.mubr.msk.f32.mxu0 %vm1411_vm3, %v1494_v21 }
 0x449   :  { %v5137_v62 = vpop.eup %5136  ;;  %4509 = vmatmul.mubr.msk.f32.vlgmr.msra.gmra.mrb[14].mxu0 %vm1411_vm3, %v1495_v26 }
 0x44a   :  { %4904 = vmatpush3.bf16.msra.mxu0 %v5635_v28  ;;  %v1496_v34 = vmul.f32 %v5137_v62, %v5123_v38  ;;  %v5139_v30 = vpop.eup %5138  ;;  %v5738_v62 = vld [vmem:[%s6020_s6] ss:$0 sm:$0xff] }
 0x44b   :  { %4906 = vmatprep.subr.bf16.mxu0 %v5647_v42  ;;  %v1497_v4 = vmul.f32 %v5139_v30, %v5121_v6 }
 0x44c   :  { %4515 = vmatprep.mubr.msk.f32.mxu0 %vm1411_vm3, %v1496_v34 }
 0x44d   :  { %v5141_v37 = vpop.eup %5140 }
 0x44e   :  { %v1498_v55 = vmul.f32 %v5141_v37, %v5127_v56  ;;  %v5143_v63 = vpop.eup %5142 }
 0x44f   :  { %v1499_v33 = vmul.f32 %v5143_v63, %v5125_v16 }
 0x451   :  { %4516 = vmatmul.mubr.msk.f32.vlgmr.msra.gmra.mrb[14].mxu0 %vm1411_vm3, %v1497_v4  ;;  %v5743_v4 = vld [vmem:[%s6021_s7] ss:$0 sm:$0xff] }
 0x452   :  { %4908 = vmatpush3.bf16.msra.mxu0 %v5647_v42  ;;  %4522 = vmatprep.mubr.msk.f32.mxu0 %vm1411_vm3, %v1498_v55 }
 0x453   :  { %4934 = vmatprep.subr.bf16.mxu0 %v5315_v17 }
 0x459   :  { %4523 = vmatmul.mubr.msk.f32.vlgmr.msra.gmra.mrb[14].mxu0 %vm1411_vm3, %v1499_v33 }
 0x45a   :  { %4936 = vmatpush3.bf16.msra.mxu0 %v5315_v17 }
 0x45b   :  { %4938 = vmatprep.subr.bf16.mxu0 %v5335_v23 }
 0x45e   :  { %4940 = vmatpush3.bf16.msra.mxu0 %v5335_v23 }
 0x45f   :  { %4942 = vmatprep.subr.bf16.mxu0 %v5355_v29 }
 0x52c   :  { %v4524_v28 = vpop.f32.mrb[14].mxu0 }
 0x52d   :  { %v5702_v6 = vadd.f32 %v4524_v28, %v5296_v1  ;;  %v1815_v42 = vpop.f32.mrb[15].mxu0 }
 0x52e   :  { %v5705_v38 = vadd.f32 %v1815_v42, %v5291_v0  ;;  %v103_v42 = vld [vmem:[%s6024_s10] sm:$0xff] }
 0x52f   :  { %v1835_v13 = vsel %vm112_vm0, %v5702_v6, 0.0 }
 0x530   :  { %1836 = vadd.xlane.f32.xlu1 %v1835_v13  ;;  %v1832_v17 = vsel %vm112_vm0, %v5705_v38, 0.0  ;;  %v104_v13 = vld [vmem:[%s6024_s10 + $0x8] sm:$0xff] }
 0x531   :  { %1833 = vadd.xlane.f32.xlu0 %v1832_v17  ;;  %v5757_v17 = vpack.c.bf16 %v104_v13, %v103_v42 }
 0x533   :  { %4918 = vmatprep.subr.bf16.mxu1 %v5757_v17 }
 0x5bd   :  { %v1837_v16 = vpop.xlane.xlu1 %1836 }
 0x5be   :  { %v1839_v23 = vmul.f32 0.03125, %v1837_v16  ;;  %v1834_v56 = vpop.xlane.xlu0 %1833  ;;  %v105_v16 = vld [vmem:[%s6024_s10 + $0x10] sm:$0xff] }
 0x5bf   :  { %v1838_v57 = vmul.f32 0.03125, %v1834_v56 }
 0x5c0   :  { %v1841_v60 = vsub.f32 %v5702_v6, %v1839_v23  ;;  %v106_v23 = vld [vmem:[%s6024_s10 + $0x18] sm:$0xff] }
 0x5c1   :  { %v1840_v1 = vsub.f32 %v5705_v38, %v1838_v57  ;;  %v5767_v56 = vpack.c.bf16 %v106_v23, %v105_v16  ;;  %v107_v57 = vld [vmem:[%s6024_s10 + $0x20] sm:$0xff] }
 0x5c2   :  { %v1843_v61 = vmul.f32 %v1841_v60, %v1841_v60 }
 0x5c3   :  { %v1842_v51 = vmul.f32 %v1840_v1, %v1840_v1 }
 0x5c4   :  { %v1847_v0 = vsel %vm112_vm0, %v1843_v61, 0.0  ;;  %v109_v61 = vld [vmem:[%s6024_s10 + $0x30] sm:$0xff] }
 0x5c5   :  { %1848 = vadd.xlane.f32.xlu1 %v1847_v0  ;;  %v1844_v5 = vsel %vm112_vm0, %v1842_v51, 0.0  ;;  %v110_v51 = vld [vmem:[%s6024_s10 + $0x38] sm:$0xff] }
 0x5c6   :  { %1845 = vadd.xlane.f32.xlu0 %v1844_v5  ;;  %v5787_v0 = vpack.c.bf16 %v110_v51, %v109_v61  ;;  %v5795_v5 = vld [vmem:[%s6023_s9] ss:$0 sm:$0xff] }
 0x652   :  { %v1849_v15 = vpop.xlane.xlu1 %1848 }
 0x653   :  { %v1851_v20 = vmul.f32 0.03125, %v1849_v15  ;;  %v1846_v50 = vpop.xlane.xlu0 %1845 }
 0x654   :  { %v1850_v47 = vmul.f32 0.03125, %v1846_v50 }
 0x655   :  { %v1853_v21 = vadd.f32 1e-05, %v1851_v20 }
 0x656   :  { %v1852_v26 = vadd.f32 1e-05, %v1850_v47 }
 0x657   :  { %5144 = vrsqrt.f32 %v1853_v21 }
 0x658   :  { %5146 = vrsqrt.f32 %v1852_v26 }
 0x661   :  { %v5145_v27 = vpop.eup %5144 }
 0x662   :  { %v5147_v34 = vpop.eup %5146  ;;  %v1857_v30 = vmul.f32 %v5145_v27, %v1841_v60  ;;  %v108_v60 = vld [vmem:[%s6024_s10 + $0x28] sm:$0xff] }
 0x663   :  { %v1856_v37 = vmul.f32 %v5147_v34, %v1840_v1  ;;  %v5777_v1 = vpack.c.bf16 %v108_v60, %v107_v57 }
 0x664   :  { %v1865_v55 = vmul.f32 %v5738_v62, %v1857_v30 }
 0x665   :  { %v1864_v63 = vmul.f32 %v5738_v62, %v1856_v37 }
 0x666   :  { %v1873_v28 = vadd.f32 %v5743_v4, %v1865_v55  ;;  %v5808_v55 = vld [vmem:[%s6025_s11] ss:$0 sm:$0xff]  ;;  %s5220_s11 = smov [#allocation2]  }
 0x667   :  { %v1872_v33 = vadd.f32 %v5743_v4, %v1864_v63  ;;  %s3976_s25 = sshll.u32 %s5220_s11, 4  ;;  %s3977_s25 = int_to_ptr.vmem [resolvable:$true] %s3976_s25 }
 0x668   :  { %s5196_s26 = scalar_lea.vmem %s3977_s25, 256  ;;  %p5201_p1 = scmp.lt.s32.totalorder %s3977_s25, %s3977_s25 }
 0x669   :  { %4533 = vmatprep.mubr.msk.f32.mxu1 %vm112_vm0, %v1872_v33  ;;  %p5197_p0 = scmp.ne.s32.totalorder %s3977_s25, %s5196_s26  ;;  %p5202_p2 = scmp.lt.s32.totalorder %s5196_s26, %s5196_s26 }
 0x66a   :  { %4534 = vmatmul.mubr.msk.f32.vlgmr.msra.gmra.mrb[18].mxu1 %vm112_vm0, %v1873_v28 }
 0x66b   :  { %4920 = vmatpush3.bf16.msra.mxu1 %v5757_v17  ;;  %p5203_p3 = por %p5202_p2, %p5201_p1 }
 0x66c   :  { %4922 = vmatprep.subr.bf16.mxu1 %v5767_v56 }
 0x66d   :  { %p5204_p4 = pnand %p5203_p3, %p5197_p0 }
 0x66f   :  { %4924 = vmatpush3.bf16.msra.mxu1 %v5767_v56 }
 0x670   :  { %4926 = vmatprep.subr.bf16.mxu1 %v5777_v1 }
 0x673   :  { %4928 = vmatpush3.bf16.msra.mxu1 %v5777_v1 }
 0x674   :  { %4930 = vmatprep.subr.bf16.mxu1 %v5787_v0 }
 0x677   :  { %4932 = vmatpush3.bf16.msra.mxu1 %v5787_v0 }
 0x678   :  { %4950 = vmatprep.subr.bf16.mxu1 %v5320_v19 }
 0x73d   :  { %v4535_v49 = vpop.f32.mrb[18].mxu1 }
 0x73e   :  { %v1958_v7 = vadd.f32 %v4535_v49, %v5795_v5  ;;  %v1952_v10 = vpop.f32.mrb[19].mxu1 }
 0x73f   :  { %v1953_v11 = vadd.f32 %v5795_v5, %v1952_v10 }
 0x740   :  { %v1964_v15 = vmul.f32 0.70710677, %v1958_v7  ;;  %v1962_v34 = vmul.f32 0.5, %v1958_v7 }
 0x741   :  { %v1963_v20 = vmul.f32 0.70710677, %v1953_v11  ;;  %v1961_v26 = vmul.f32 0.5, %v1953_v11 }
 0x742   :  { %5148 = verf.f32 %v1964_v15 }
 0x743   :  { %5150 = verf.f32 %v1963_v20 }
 0x74c   :  { %v5149_v50 = vpop.eup %5148 }
 0x74d   :  { %v5151_v47 = vpop.eup %5150  ;;  %v1968_v21 = vadd.f32 1.0, %v5149_v50 }
 0x74e   :  { %v1967_v27 = vadd.f32 1.0, %v5151_v47 }
 0x74f   :  { %v1970_v37 = vmul.f32 %v1968_v21, %v1962_v34 }
 0x750   :  { %v1969_v30 = vmul.f32 %v1967_v27, %v1961_v26 }
 0x752   :  { %4552 = vmatprep.mubr.msk.f32.mxu1 %vm1977_vm4, %v1969_v30 }
 0x753   :  { %4553 = vmatmul.mubr.msk.f32.vlgmr.msra.gmra.mrb[20].mxu1 %vm1977_vm4, %v1970_v37 }
 0x754   :  { %4952 = vmatpush3.bf16.msra.mxu1 %v5320_v19 }
 0x755   :  { %4954 = vmatprep.subr.bf16.mxu1 %v5340_v25 }
 0x758   :  { %4956 = vmatpush3.bf16.msra.mxu1 %v5340_v25 }
 0x759   :  { %4966 = vmatprep.subr.bf16.mxu1 %v5360_v31 }
 0x826   :  { %v4554_v63 = vpop.f32.mrb[20].mxu1 }
 0x827   :  { %v2056_v33 = vadd.f32 %v4554_v63, %v5808_v55  ;;  %v2050_v28 = vpop.f32.mrb[21].mxu1 }
 0x828   :  { %v2051_v42 = vadd.f32 %v5808_v55, %v2050_v28 }
 0x829   :  { %v5813_v13 = vadd.f32 %v2056_v33, %v5702_v6 }
 0x82a   :  { %v5816_v19 = vadd.f32 %v2051_v42, %v5705_v38 }
 0x82b   :  { %v2064_v25 = vsel %vm112_vm0, %v5813_v13, 0.0 }
 0x82c   :  { %2065 = vadd.xlane.f32.xlu1 %v2064_v25  ;;  %v2061_v16 = vsel %vm112_vm0, %v5816_v19, 0.0 }
 0x82d   :  { %2062 = vadd.xlane.f32.xlu0 %v2061_v16 }
 0x8b9   :  { %v2066_v23 = vpop.xlane.xlu1 %2065 }
 0x8ba   :  { %v2068_v57 = vmul.f32 0.03125, %v2066_v23  ;;  %v2063_v60 = vpop.xlane.xlu0 %2062 }
 0x8bb   :  { %v2067_v61 = vmul.f32 0.03125, %v2063_v60 }
 0x8bc   :  { %v2070_v51 = vsub.f32 %v5813_v13, %v2068_v57 }
 0x8bd   :  { %v2069_v6 = vsub.f32 %v5816_v19, %v2067_v61 }
 0x8be   :  { %v2072_v49 = vmul.f32 %v2070_v51, %v2070_v51 }
 0x8bf   :  { %v2071_v7 = vmul.f32 %v2069_v6, %v2069_v6 }
 0x8c0   :  { %v2076_v38 = vsel %vm112_vm0, %v2072_v49, 0.0 }
 0x8c1   :  { %2077 = vadd.xlane.f32.xlu1 %v2076_v38  ;;  %v2073_v10 = vsel %vm112_vm0, %v2071_v7, 0.0 }
 0x8c2   :  { %2074 = vadd.xlane.f32.xlu0 %v2073_v10 }
 0x94e   :  { %v2078_v11 = vpop.xlane.xlu1 %2077 }
 0x94f   :  { %v2080_v15 = vmul.f32 0.03125, %v2078_v11  ;;  %v2075_v20 = vpop.xlane.xlu0 %2074 }
 0x950   :  { %v2079_v50 = vmul.f32 0.03125, %v2075_v20 }
 0x951   :  { %v2082_v47 = vadd.f32 1e-05, %v2080_v15 }
 0x952   :  { %v2081_v21 = vadd.f32 1e-05, %v2079_v50 }
 0x953   :  { %5152 = vrsqrt.f32 %v2082_v47 }
 0x954   :  { %5154 = vrsqrt.f32 %v2081_v21 }
 0x95d   :  { %v5153_v26 = vpop.eup %5152 }
 0x95e   :  { %v5155_v27 = vpop.eup %5154  ;;  %v2086_v34 = vmul.f32 %v5153_v26, %v2070_v51 }
 0x95f   :  { %v2085_v30 = vmul.f32 %v5155_v27, %v2069_v6 }
 0x960   :  { %v2088_v37 = vmul.f32 %v5367_v39, %v2086_v34 }
 0x961   :  { %v2087_v63 = vmul.f32 %v5367_v39, %v2085_v30 }
 0x962   :  { %v2090_v28 = vadd.f32 %v5372_v41, %v2088_v37 }
 0x963   :  { %v2089_v33 = vadd.f32 %v5372_v41, %v2087_v63 }
 0x965   :  { %4563 = vmatprep.mubr.msk.f32.mxu0 %vm112_vm0, %v2089_v33  ;;  %4585 = vmatprep.mubr.msk.f32.mxu1 %vm112_vm0, %v2089_v33 }
 0x966   :  { %4564 = vmatmul.mubr.msk.f32.vlgmr.msra.gmra.mrb[16].mxu0 %vm112_vm0, %v2090_v28  ;;  %4586 = vmatmul.mubr.msk.f32.vlgmr.msra.gmra.mrb[22].mxu1 %vm112_vm0, %v2090_v28 }
 0x967   :  { %4944 = vmatpush3.bf16.msra.mxu0 %v5355_v29  ;;  %4968 = vmatpush3.bf16.msra.mxu1 %v5360_v31 }
 0x968   :  { %4574 = vmatprep.mubr.msk.f32.mxu0 %vm112_vm0, %v2089_v33  ;;  %4607 = vmatprep.mubr.msk.f32.mxu1 %vm112_vm0, %v2089_v33 }
 0x969   :  { %4946 = vmatprep.subr.bf16.mxu0 %v5401_v53  ;;  %4970 = vmatprep.subr.bf16.mxu1 %v5403_v54 }
 0x96b   :  { %4948 = vmatpush3.bf16.msra.mxu0 %v5401_v53  ;;  %4972 = vmatpush3.bf16.msra.mxu1 %v5403_v54 }
 0x96c   :  { %4958 = vmatprep.subr.bf16.mxu0 %v5424_v58  ;;  %4982 = vmatprep.subr.bf16.mxu1 %v5426_v59 }
 0x96e   :  { %4575 = vmatmul.mubr.msk.f32.vlgmr.msra.gmra.mrb[18].mxu0 %vm112_vm0, %v2090_v28  ;;  %4608 = vmatmul.mubr.msk.f32.vlgmr.msra.gmra.mrb[24].mxu1 %vm112_vm0, %v2090_v28 }
 0x96f   :  { %4960 = vmatpush3.bf16.msra.mxu0 %v5424_v58  ;;  %4596 = vmatprep.mubr.msk.f32.mxu0 %vm112_vm0, %v2089_v33 }
 0x970   :  { %4984 = vmatpush3.bf16.msra.mxu1 %v5426_v59  ;;  %4629 = vmatprep.mubr.msk.f32.mxu1 %vm112_vm0, %v2089_v33 }
 0x971   :  { %4962 = vmatprep.subr.bf16.mxu0 %v5446_v2  ;;  %4986 = vmatprep.subr.bf16.mxu1 %v5448_v3 }
 0x973   :  { %4964 = vmatpush3.bf16.msra.mxu0 %v5446_v2 }
 0x974   :  { %4988 = vmatpush3.bf16.msra.mxu1 %v5448_v3  ;;  %4974 = vmatprep.subr.bf16.mxu0 %v5472_v8 }
 0x975   :  { %4998 = vmatprep.subr.bf16.mxu1 %v5476_v9 }
 0x976   :  { %4597 = vmatmul.mubr.msk.f32.vlgmr.msra.gmra.mrb[20].mxu0 %vm112_vm0, %v2090_v28 }
 0x977   :  { %4630 = vmatmul.mubr.msk.f32.vlgmr.msra.gmra.mrb[26].mxu1 %vm112_vm0, %v2090_v28  ;;  %4976 = vmatpush3.bf16.msra.mxu0 %v5472_v8 }
 0x978   :  { %4618 = vmatprep.mubr.msk.f32.mxu0 %vm112_vm0, %v2089_v33  ;;  %5000 = vmatpush3.bf16.msra.mxu1 %v5476_v9 }
 0x979   :  { %4651 = vmatprep.mubr.msk.f32.mxu1 %vm112_vm0, %v2089_v33  ;;  %4978 = vmatprep.subr.bf16.mxu0 %v5494_v14 }
 0x97a   :  { %5002 = vmatprep.subr.bf16.mxu1 %v5504_v18 }
 0x97b   :  { %4980 = vmatpush3.bf16.msra.mxu0 %v5494_v14 }
 0x97c   :  { %5004 = vmatpush3.bf16.msra.mxu1 %v5504_v18  ;;  %4990 = vmatprep.subr.bf16.mxu0 %v5518_v22 }
 0x97d   :  { %5014 = vmatprep.subr.bf16.mxu1 %v5523_v24 }
 0x97e   :  { %4619 = vmatmul.mubr.msk.f32.vlgmr.msra.gmra.mrb[22].mxu0 %vm112_vm0, %v2090_v28 }
 0x97f   :  { %4652 = vmatmul.mubr.msk.f32.vlgmr.msra.gmra.mrb[28].mxu1 %vm112_vm0, %v2090_v28  ;;  %4992 = vmatpush3.bf16.msra.mxu0 %v5518_v22 }
 0x980   :  { %4640 = vmatprep.mubr.msk.f32.mxu0 %vm112_vm0, %v2089_v33  ;;  %5016 = vmatpush3.bf16.msra.mxu1 %v5523_v24 }
 0x981   :  { %4673 = vmatprep.mubr.msk.f32.mxu1 %vm112_vm0, %v2089_v33  ;;  %4994 = vmatprep.subr.bf16.mxu0 %v5542_v32 }
 0x982   :  { %5018 = vmatprep.subr.bf16.mxu1 %v5552_v35 }
 0x983   :  { %4996 = vmatpush3.bf16.msra.mxu0 %v5542_v32 }
 0x984   :  { %5020 = vmatpush3.bf16.msra.mxu1 %v5552_v35  ;;  %5006 = vmatprep.subr.bf16.mxu0 %v5560_v36 }
 0x986   :  { %4641 = vmatmul.mubr.msk.f32.vlgmr.msra.gmra.mrb[24].mxu0 %vm112_vm0, %v2090_v28 }
 0x987   :  { %4674 = vmatmul.mubr.msk.f32.vlgmr.msra.gmra.mrb[30].mxu1 %vm112_vm0, %v2090_v28  ;;  %5008 = vmatpush3.bf16.msra.mxu0 %v5560_v36 }
 0x988   :  { %4662 = vmatprep.mubr.msk.f32.mxu0 %vm112_vm0, %v2089_v33  ;;  %5010 = vmatprep.subr.bf16.mxu0 %v5575_v40 }
 0x98b   :  { %5012 = vmatpush3.bf16.msra.mxu0 %v5575_v40 }
 0x98c   :  { %5022 = vmatprep.subr.bf16.mxu0 %v5591_v45 }
 0x98e   :  { %4663 = vmatmul.mubr.msk.f32.vlgmr.msra.gmra.mrb[26].mxu0 %vm112_vm0, %v2090_v28 }
 0x98f   :  { %5024 = vmatpush3.bf16.msra.mxu0 %v5591_v45  ;;  %4684 = vmatprep.mubr.msk.f32.mxu0 %vm112_vm0, %v2089_v33 }
 0x990   :  { %5026 = vmatprep.subr.bf16.mxu0 %v5601_v48 }
 0x993   :  { %5028 = vmatpush3.bf16.msra.mxu0 %v5601_v48 }
 0x996   :  { %4685 = vmatmul.mubr.msk.f32.vlgmr.msra.gmra.mrb[28].mxu0 %vm112_vm0, %v2090_v28 }
 0xa39   :  { %v4565_v29 = vpop.f32.mrb[16].mxu0  ;;  %v4587_v31 = vpop.f32.mrb[22].mxu1 }
 0xa3a   :  { %v2163_v39 = vpop.f32.mrb[17].mxu0  ;;  %v2313_v41 = vpop.f32.mrb[23].mxu1 }
 0xa3b   :  { %4691 = vmatprep.mubr.msk.f32.mxu1 %vm1062_vm1, %v2163_v39 }
 0xa41   :  { %v4576_v53 = vpop.f32.mrb[18].mxu0  ;;  %v4609_v54 = vpop.f32.mrb[24].mxu1 }
 0xa42   :  { %v2238_v58 = vpop.f32.mrb[19].mxu0  ;;  %v2463_v59 = vpop.f32.mrb[25].mxu1 }
 0xa43   :  { %v5029_v2 = vpack.c.bf16 %v4609_v54, %v2463_v59  ;;  %4698 = vmatprep.mubr.msk.f32.mxu0 %vm1062_vm1, %v2238_v58 }
 0xa45   :  { %5031 = vmatprep.subr.msk.bf16.mxu1 %vm5615_vm2, %v5029_v2 }
 0xa46   :  { %5034 = vmatpush3.bf16.xpose.msk.msra.mxu1 %vm5615_vm2, %v5029_v2 }
 0xa49   :  { %v4598_v3 = vpop.f32.mrb[20].mxu0 }
 0xa4a   :  { %v4631_v8 = vpop.f32.mrb[26].mxu1  ;;  %v2388_v9 = vpop.f32.mrb[21].mxu0 }
 0xa4b   :  { %v2613_v14 = vpop.f32.mrb[27].mxu1 }
 0xa4c   :  { %v5041_v18 = vpack.c.bf16 %v4631_v8, %v2613_v14 }
 0xa4d   :  { %4692 = vmatmul.mubr.msk.f32.vlgmr.msra.gmra.mrb[32].mxu1 %vm1062_vm1, %v4565_v29 }
 0xa4e   :  { %5043 = vmatprep.subr.msk.bf16.mxu1 %vm5615_vm2, %v5041_v18  ;;  %4705 = vmatprep.mubr.msk.f32.mxu1 %vm1062_vm1, %v2313_v41 }
 0xa4f   :  { %5046 = vmatpush3.bf16.xpose.msk.msra.mxu1 %vm5615_vm2, %v5041_v18 }
 0xa51   :  { %v4620_v22 = vpop.f32.mrb[22].mxu0 }
 0xa52   :  { %v4653_v24 = vpop.f32.mrb[28].mxu1  ;;  %v2538_v32 = vpop.f32.mrb[23].mxu0 }
 0xa53   :  { %v5035_v35 = vpack.c.bf16 %v4620_v22, %v2538_v32  ;;  %v2763_v36 = vpop.f32.mrb[29].mxu1 }
 0xa54   :  { %v5053_v40 = vpack.c.bf16 %v4653_v24, %v2763_v36 }
 0xa55   :  { %5037 = vmatprep.subr.msk.bf16.mxu0 %vm5615_vm2, %v5035_v35 }
 0xa56   :  { %4706 = vmatmul.mubr.msk.f32.vlgmr.msra.gmra.mrb[34].mxu1 %vm1062_vm1, %v4587_v31  ;;  %5054 = vmatprep.subr.bf16.mxu1 %v5053_v40 }
 0xa57   :  { %5040 = vmatpush3.bf16.xpose.msk.msra.mxu0 %vm5615_vm2, %v5035_v35  ;;  %5056 = vmatpush3.bf16.msra.mxu1 %v5053_v40 }
 0xa59   :  { %v4642_v45 = vpop.f32.mrb[24].mxu0 }
 0xa5a   :  { %v4675_v48 = vpop.f32.mrb[30].mxu1  ;;  %v2688_v42 = vpop.f32.mrb[25].mxu0 }
 0xa5b   :  { %v5047_v25 = vpack.c.bf16 %v4642_v45, %v2688_v42  ;;  %v2913_v16 = vpop.f32.mrb[31].mxu1 }
 0xa5c   :  { %v5909_v23 = vpack.c.bf16 %v4675_v48, %v2913_v16 }
 0xa5d   :  { %5049 = vmatprep.subr.msk.bf16.mxu0 %vm5615_vm2, %v5047_v25 }
 0xa5e   :  { %4699 = vmatmul.mubr.msk.f32.vlgmr.msra.gmra.mrb[30].mxu0 %vm1062_vm1, %v4576_v53 }
 0xa5f   :  { %5052 = vmatpush3.bf16.xpose.msk.msra.mxu0 %vm5615_vm2, %v5047_v25  ;;  %4712 = vmatprep.mubr.msk.f32.mxu0 %vm1062_vm1, %v2388_v9 }
 0xa60   :  { %5070 = vmatprep.subr.bf16.mxu0 %v5721_v52 }
 0xa61   :  { %v4664_v57 = vpop.f32.mrb[26].mxu0 }
 0xa62   :  { %v2838_v60 = vpop.f32.mrb[27].mxu0 }
 0xa63   :  { %v5918_v61 = vpack.c.bf16 %v4664_v57, %v2838_v60 }
 0xa65   :  { %5058 = vmatprep.subr.bf16.mxu1 %v5918_v61 }
 0xa66   :  { %4713 = vmatmul.mubr.msk.f32.vlgmr.msra.gmra.mrb[32].mxu0 %vm1062_vm1, %v4598_v3 }
 0xa67   :  { %5072 = vmatpush3.bf16.msra.mxu0 %v5721_v52 }
 0xa68   :  { %5074 = vmatprep.subr.bf16.mxu0 %v5730_v12 }
 0xa69   :  { %v4686_v51 = vpop.f32.mrb[28].mxu0 }
 0xa6a   :  { %v2988_v6 = vpop.f32.mrb[29].mxu0 }
 0xa6b   :  { %v5924_v44 = vpack.c.bf16 %v4686_v51, %v2988_v6  ;;  %5076 = vmatpush3.bf16.msra.mxu0 %v5730_v12 }
 0xa6c   :  { %5078 = vmatprep.subr.bf16.mxu0 %v5757_v17 }
 0xb20   :  { %v4693_v49 = vpop.f32.mrb[32].mxu1 }
 0xb21   :  { %v3081_v7 = vadd.f32 %v4693_v49, %v5652_v43  ;;  %v3075_v38 = vpop.f32.mrb[33].mxu1 }
 0xb22   :  { %v3076_v10 = vadd.f32 %v3075_v38, %v5657_v46 }
 0xb23   :  { %v3348_v11 = vsel %vm1411_vm3, %v3081_v7, -inf }
 0xb24   :  { %3349 = vmax.xlane.f32.xlu1 %v3348_v11  ;;  %v3345_v52 = vsel %vm1411_vm3, %v3076_v10, -inf }
 0xb25   :  { %3346 = vmax.xlane.f32.xlu0 %v3345_v52 }
 0xb29   :  { %v4707_v15 = vpop.f32.mrb[34].mxu1 }
 0xb2a   :  { %v3249_v20 = vpop.f32.mrb[35].mxu1  ;;  %v3255_v26 = vadd.f32 %v4707_v15, %v5652_v43 }
 0xb2b   :  { %v3250_v34 = vadd.f32 %v3249_v20, %v5657_v46 }
 0xb2c   :  { %v3360_v37 = vsel %vm1411_vm3, %v3255_v26, -inf }
 0xb2d   :  { %v3357_v33 = vsel %vm1411_vm3, %v3250_v34, -inf }
 0xb31   :  { %v4700_v50 = vpop.f32.mrb[30].mxu0 }
 0xb32   :  { %v3168_v47 = vadd.f32 %v4700_v50, %v5652_v43  ;;  %v3162_v12 = vpop.f32.mrb[31].mxu0 }
 0xb33   :  { %v3163_v21 = vadd.f32 %v3162_v12, %v5657_v46 }
 0xb34   :  { %v3354_v27 = vsel %vm1411_vm3, %v3168_v47, -inf }
 0xb35   :  { %3355 = vmax.xlane.f32.xlu1 %v3354_v27  ;;  %v3351_v30 = vsel %vm1411_vm3, %v3163_v21, -inf }
 0xb36   :  { %3352 = vmax.xlane.f32.xlu0 %v3351_v30 }
 0xb39   :  { %3361 = vmax.xlane.f32.xlu1 %v3360_v37  ;;  %v4714_v63 = vpop.f32.mrb[32].mxu0 }
 0xb3a   :  { %v3342_v28 = vadd.f32 %v4714_v63, %v5652_v43  ;;  %v3336_v29 = vpop.f32.mrb[33].mxu0  ;;  %3358 = vmax.xlane.f32.xlu0 %v3357_v33 }
 0xb3b   :  { %v3337_v31 = vadd.f32 %v3336_v29, %v5657_v46 }
 0xb3c   :  { %v3366_v39 = vsel %vm1411_vm3, %v3342_v28, -inf }
 0xb3d   :  { %3367 = vmax.xlane.f32.xlu1 %v3366_v39  ;;  %v3363_v41 = vsel %vm1411_vm3, %v3337_v31, -inf }
 0xb3e   :  { %3364 = vmax.xlane.f32.xlu0 %v3363_v41 }
 0xbb1   :  { %v3350_v53 = vpop.xlane.xlu1 %3349 }
 0xbb2   :  { %v3370_v54 = vsub.f32 %v3081_v7, %v3350_v53  ;;  %v3347_v58 = vpop.xlane.xlu0 %3346 }
 0xbb3   :  { %v3369_v59 = vsub.f32 %v3076_v10, %v3347_v58 }
 0xbb4   :  { %v3379_v2 = vmul.f32 1.442695, %v3370_v54 }
 0xbb5   :  { %v3377_v3 = vmul.f32 1.442695, %v3369_v59 }
 0xbb6   :  { %5156 = vpow2.f32 %v3379_v2 }
 0xbb7   :  { %5158 = vpow2.f32 %v3377_v3 }
 0xbc0   :  { %v5157_v8 = vpop.eup %5156 }
 0xbc1   :  { %v5159_v43 = vpop.eup %5158  ;;  %v3396_v9 = vsel %vm1411_vm3, %v5157_v8, 0.0 }
 0xbc2   :  { %v3356_v14 = vpop.xlane.xlu1 %3355  ;;  %3397 = vadd.xlane.f32.xlu1 %v3396_v9  ;;  %v3393_v46 = vsel %vm1411_vm3, %v5159_v43, 0.0 }
 0xbc3   :  { %v3372_v18 = vsub.f32 %v3168_v47, %v3356_v14  ;;  %v3353_v22 = vpop.xlane.xlu0 %3352  ;;  %3394 = vadd.xlane.f32.xlu0 %v3393_v46 }
 0xbc4   :  { %v3371_v24 = vsub.f32 %v3163_v21, %v3353_v22 }
 0xbc5   :  { %v3383_v32 = vmul.f32 1.442695, %v3372_v18 }
 0xbc6   :  { %v3381_v35 = vmul.f32 1.442695, %v3371_v24  ;;  %v3362_v36 = vpop.xlane.xlu1 %3361 }
 0xbc7   :  { %5160 = vpow2.f32 %v3383_v32  ;;  %v3374_v40 = vsub.f32 %v3255_v26, %v3362_v36  ;;  %v3359_v45 = vpop.xlane.xlu0 %3358 }
 0xbc8   :  { %5162 = vpow2.f32 %v3381_v35  ;;  %v3373_v48 = vsub.f32 %v3250_v34, %v3359_v45 }
 0xbc9   :  { %v3387_v42 = vmul.f32 1.442695, %v3374_v40 }
 0xbca   :  { %v3385_v25 = vmul.f32 1.442695, %v3373_v48  ;;  %v3368_v16 = vpop.xlane.xlu1 %3367 }
 0xbcb   :  { %5164 = vpow2.f32 %v3387_v42  ;;  %v3376_v57 = vsub.f32 %v3342_v28, %v3368_v16  ;;  %v3365_v60 = vpop.xlane.xlu0 %3364 }
 0xbcc   :  { %5166 = vpow2.f32 %v3385_v25  ;;  %v3375_v51 = vsub.f32 %v3337_v31, %v3365_v60 }
 0xbcd   :  { %v3391_v6 = vmul.f32 1.442695, %v3376_v57 }
 0xbce   :  { %v3389_v49 = vmul.f32 1.442695, %v3375_v51 }
 0xbcf   :  { %5168 = vpow2.f32 %v3391_v6 }
 0xbd0   :  { %5170 = vpow2.f32 %v3389_v49 }
 0xbd1   :  { %v5161_v7 = vpop.eup %5160 }
 0xbd2   :  { %v5163_v38 = vpop.eup %5162  ;;  %v3402_v10 = vsel %vm1411_vm3, %v5161_v7, 0.0 }
 0xbd3   :  { %3403 = vadd.xlane.f32.xlu1 %v3402_v10  ;;  %v3399_v11 = vsel %vm1411_vm3, %v5163_v38, 0.0 }
 0xbd4   :  { %3400 = vadd.xlane.f32.xlu0 %v3399_v11 }
 0xbd5   :  { %v5165_v52 = vpop.eup %5164 }
 0xbd6   :  { %v5167_v15 = vpop.eup %5166  ;;  %v3408_v20 = vsel %vm1411_vm3, %v5165_v52, 0.0 }
 0xbd7   :  { %3409 = vadd.xlane.f32.xlu1 %v3408_v20  ;;  %v3405_v50 = vsel %vm1411_vm3, %v5167_v15, 0.0 }
 0xbd8   :  { %3406 = vadd.xlane.f32.xlu0 %v3405_v50 }
 0xbd9   :  { %v5169_v47 = vpop.eup %5168 }
 0xbda   :  { %v5171_v12 = vpop.eup %5170  ;;  %v3414_v21 = vsel %vm1411_vm3, %v5169_v47, 0.0 }
 0xbdb   :  { %3415 = vadd.xlane.f32.xlu1 %v3414_v21  ;;  %v3411_v26 = vsel %vm1411_vm3, %v5171_v12, 0.0 }
 0xbdc   :  { %3412 = vadd.xlane.f32.xlu0 %v3411_v26 }
 0xc4f   :  { %v3398_v27 = vpop.xlane.xlu1 %3397 }
 0xc50   :  { %5172 = vrcp.f32 %v3398_v27  ;;  %v3395_v34 = vpop.xlane.xlu0 %3394 }
 0xc51   :  { %5174 = vrcp.f32 %v3395_v34 }
 0xc5a   :  { %v5173_v30 = vpop.eup %5172 }
 0xc5b   :  { %v5175_v37 = vpop.eup %5174  ;;  %v3426_v33 = vmul.f32 %v5173_v30, %v5157_v8 }
 0xc5c   :  { %v3425_v63 = vmul.f32 %v5175_v37, %v5159_v43 }
 0xc5e   :  { %4719 = vmatprep.mubr.msk.f32.mxu1 %vm1411_vm3, %v3425_v63 }
 0xc5f   :  { %4720 = vmatmul.mubr.msk.f32.vlgmr.msra.gmra.mrb[36].mxu1 %vm1411_vm3, %v3426_v33 }
 0xc60   :  { %v3404_v28 = vpop.xlane.xlu1 %3403  ;;  %5060 = vmatpush3.bf16.msra.mxu1 %v5918_v61 }
 0xc61   :  { %5176 = vrcp.f32 %v3404_v28  ;;  %5062 = vmatprep.subr.bf16.mxu1 %v5909_v23  ;;  %v3401_v29 = vpop.xlane.xlu0 %3400 }
 0xc62   :  { %5178 = vrcp.f32 %v3401_v29 }
 0xc64   :  { %v3410_v39 = vpop.xlane.xlu1 %3409 }
 0xc65   :  { %v3407_v31 = vpop.xlane.xlu0 %3406 }
 0xc66   :  { %5180 = vrcp.f32 %v3407_v31 }
 0xc67   :  { %5182 = vrcp.f32 %v3410_v39 }
 0xc68   :  { %v3416_v2 = vpop.xlane.xlu1 %3415 }
 0xc69   :  { %v3413_v41 = vpop.xlane.xlu0 %3412 }
 0xc6a   :  { %5184 = vrcp.f32 %v3413_v41 }
 0xc6b   :  { %v5177_v53 = vpop.eup %5176  ;;  %5186 = vrcp.f32 %v3416_v2 }
 0xc6c   :  { %v5179_v54 = vpop.eup %5178  ;;  %v3428_v59 = vmul.f32 %v5177_v53, %v5161_v7 }
 0xc6d   :  { %v3427_v58 = vmul.f32 %v5179_v54, %v5163_v38 }
 0xc6f   :  { %4726 = vmatprep.mubr.msk.f32.mxu1 %vm1411_vm3, %v3427_v58 }
 0xc70   :  { %v5181_v3 = vpop.eup %5180  ;;  %4727 = vmatmul.mubr.msk.f32.vlgmr.msra.gmra.mrb[36].mxu1 %vm1411_vm3, %v3428_v59 }
 0xc71   :  { %5064 = vmatpush3.bf16.msra.mxu1 %v5909_v23  ;;  %v3429_v61 = vmul.f32 %v5181_v3, %v5167_v15  ;;  %v5183_v8 = vpop.eup %5182 }
 0xc72   :  { %5066 = vmatprep.subr.bf16.mxu1 %v5924_v44  ;;  %v3430_v9 = vmul.f32 %v5183_v8, %v5165_v52 }
 0xc73   :  { %4733 = vmatprep.mubr.msk.f32.mxu1 %vm1411_vm3, %v3429_v61 }
 0xc74   :  { %v5185_v43 = vpop.eup %5184 }
 0xc75   :  { %v3431_v14 = vmul.f32 %v5185_v43, %v5171_v12  ;;  %v5187_v46 = vpop.eup %5186 }
 0xc76   :  { %v3432_v18 = vmul.f32 %v5187_v46, %v5169_v47 }
 0xc78   :  { %4734 = vmatmul.mubr.msk.f32.vlgmr.msra.gmra.mrb[36].mxu1 %vm1411_vm3, %v3430_v9 }
 0xc79   :  { %5068 = vmatpush3.bf16.msra.mxu1 %v5924_v44  ;;  %4740 = vmatprep.mubr.msk.f32.mxu1 %vm1411_vm3, %v3431_v14 }
 0xc80   :  { %4741 = vmatmul.mubr.msk.f32.vlgmr.msra.gmra.mrb[36].mxu1 %vm1411_vm3, %v3432_v18 }
 0xd53   :  { %v4742_v23 = vpop.f32.mrb[36].mxu1 }
 0xd54   :  { %v5966_v22 = vadd.f32 %v4742_v23, %v5813_v13  ;;  %v3748_v24 = vpop.f32.mrb[37].mxu1 }
 0xd55   :  { %v5969_v32 = vadd.f32 %v3748_v24, %v5816_v19 }
 0xd56   :  { %v3768_v35 = vsel %vm112_vm0, %v5966_v22, 0.0 }
 0xd57   :  { %3769 = vadd.xlane.f32.xlu1 %v3768_v35  ;;  %v3765_v44 = vsel %vm112_vm0, %v5969_v32, 0.0 }
 0xd58   :  { %3766 = vadd.xlane.f32.xlu0 %v3765_v44 }
 0xde4   :  { %v3770_v36 = vpop.xlane.xlu1 %3769 }
 0xde5   :  { %v3772_v40 = vmul.f32 0.03125, %v3770_v36  ;;  %v3767_v45 = vpop.xlane.xlu0 %3766 }
 0xde6   :  { %v3771_v48 = vmul.f32 0.03125, %v3767_v45 }
 0xde7   :  { %v3774_v42 = vsub.f32 %v5966_v22, %v3772_v40 }
 0xde8   :  { %v3773_v13 = vsub.f32 %v5969_v32, %v3771_v48 }
 0xde9   :  { %v3776_v25 = vmul.f32 %v3774_v42, %v3774_v42 }
 0xdea   :  { %v3775_v16 = vmul.f32 %v3773_v13, %v3773_v13 }
 0xdeb   :  { %v3780_v19 = vsel %vm112_vm0, %v3776_v25, 0.0 }
 0xdec   :  { %3781 = vadd.xlane.f32.xlu1 %v3780_v19  ;;  %v3777_v57 = vsel %vm112_vm0, %v3775_v16, 0.0 }
 0xded   :  { %3778 = vadd.xlane.f32.xlu0 %v3777_v57 }
 0xe79   :  { %v3782_v60 = vpop.xlane.xlu1 %3781 }
 0xe7a   :  { %v3784_v51 = vmul.f32 0.03125, %v3782_v60  ;;  %v3779_v6 = vpop.xlane.xlu0 %3778 }
 0xe7b   :  { %v3783_v49 = vmul.f32 0.03125, %v3779_v6 }
 0xe7c   :  { %v3786_v7 = vadd.f32 1e-05, %v3784_v51 }
 0xe7d   :  { %v3785_v38 = vadd.f32 1e-05, %v3783_v49 }
 0xe7e   :  { %5188 = vrsqrt.f32 %v3786_v7 }
 0xe7f   :  { %5190 = vrsqrt.f32 %v3785_v38 }
 0xe88   :  { %v5189_v10 = vpop.eup %5188 }
 0xe89   :  { %v5191_v11 = vpop.eup %5190  ;;  %v3790_v52 = vmul.f32 %v5189_v10, %v3774_v42 }
 0xe8a   :  { %v3789_v15 = vmul.f32 %v5191_v11, %v3773_v13 }
 0xe8b   :  { %v3792_v20 = vmul.f32 %v5738_v62, %v3790_v52 }
 0xe8c   :  { %v3791_v50 = vmul.f32 %v5738_v62, %v3789_v15 }
 0xe8d   :  { %v3794_v12 = vadd.f32 %v5743_v4, %v3792_v20 }
 0xe8e   :  { %v3793_v47 = vadd.f32 %v5743_v4, %v3791_v50 }
 0xe90   :  { %4751 = vmatprep.mubr.msk.f32.mxu0 %vm112_vm0, %v3793_v47 }
 0xe91   :  { %4752 = vmatmul.mubr.msk.f32.vlgmr.msra.gmra.mrb[34].mxu0 %vm112_vm0, %v3794_v12 }
 0xe92   :  { %5080 = vmatpush3.bf16.msra.mxu0 %v5757_v17 }
 0xe93   :  { %5082 = vmatprep.subr.bf16.mxu0 %v5767_v56 }
 0xe96   :  { %5084 = vmatpush3.bf16.msra.mxu0 %v5767_v56 }
 0xe97   :  { %5086 = vmatprep.subr.bf16.mxu0 %v5777_v1 }
 0xe9a   :  { %5088 = vmatpush3.bf16.msra.mxu0 %v5777_v1 }
 0xe9b   :  { %5090 = vmatprep.subr.bf16.mxu0 %v5787_v0 }
 0xe9e   :  { %5092 = vmatpush3.bf16.msra.mxu0 %v5787_v0 }
 0xf64   :  { %v4753_v62 = vpop.f32.mrb[34].mxu0 }
 0xf65   :  { %v3873_v4 = vadd.f32 %v4753_v62, %v5795_v5  ;;  %v3867_v21 = vpop.f32.mrb[35].mxu0 }
 0xf66   :  { %v3868_v26 = vadd.f32 %v5795_v5, %v3867_v21 }
 0xf67   :  { %v3879_v27 = vmul.f32 0.70710677, %v3873_v4  ;;  %v3877_v1 = vmul.f32 0.5, %v3873_v4 }
 0xf68   :  { %v3878_v17 = vmul.f32 0.70710677, %v3868_v26  ;;  %v3876_v37 = vmul.f32 0.5, %v3868_v26 }
 0xf69   :  { %5192 = verf.f32 %v3879_v27 }
 0xf6a   :  { %5194 = verf.f32 %v3878_v17 }
 0xf73   :  { %v5193_v34 = vpop.eup %5192 }
 0xf74   :  { %v5195_v56 = vpop.eup %5194  ;;  %v3883_v30 = vadd.f32 1.0, %v5193_v34 }
 0xf75   :  { %v3882_v63 = vadd.f32 1.0, %v5195_v56 }
 0xf76   :  { %v3885_v28 = vmul.f32 %v3883_v30, %v3877_v1 }
 0xf77   :  { %v3884_v33 = vmul.f32 %v3882_v63, %v3876_v37 }
 0xf79   :  { %4770 = vmatprep.mubr.msk.f32.mxu0 %vm1977_vm4, %v3884_v33 }
 0xf7a   :  { %4771 = vmatmul.mubr.msk.f32.vlgmr.msra.gmra.mrb[36].mxu0 %vm1977_vm4, %v3885_v28 }
0x104d   :  { %v4772_v0 = vpop.f32.mrb[36].mxu0 }
0x104e   :  { %v3964_v29 = vadd.f32 %v4772_v0, %v5808_v55  ;;  %v3958_v5 = vpop.f32.mrb[37].mxu0 }
0x104f   :  { %v3959_v31 = vadd.f32 %v5808_v55, %v3958_v5 }
0x1050   :  { %v3968_v39 = vadd.f32 %v3964_v29, %v5966_v22 }
0x1051   :  { %v3967_v41 = vadd.f32 %v3959_v31, %v5969_v32 }
0x1052   :  { %3970 = vst.msk [vmem:[#allocation2 + $0x8] sm:$0xff] %vm112_vm0, %v3968_v39 }
0x1053   :  { %3969 = vst.msk [vmem:[#allocation2] sm:$0xff] %vm112_vm0, %v3967_v41 }
0x1054   :  { %5207 = shalt.err (!%p5204_p4)
}
0x1055   :  { %s5208_s28 = scalar_lea.hbm %s6026_s12, 256 }
0x1056   :  { %p5209_p5 = scmp.ne.s32.totalorder %s6026_s12, %s5208_s28  ;;  %p5212_p6 = scmp.lt.u32.totalorder %s5208_s28, %s6026_s12 }
0x1058   :  { %p5214_p7 = pnand %p5212_p6, %p5209_p5 }
0x105a   :  { %5217 = shalt.err (!%p5214_p7)
}
0x105b   :  { %s5221_s6 = smov 128   ;;  %s5222_s14 = smov 8  }
0x105c   :  { %3982 = dma.vmem_to_hbm [thread:$0]  %s3977_s25, 256, %s6026_s12, [#allocation3], %s5221_s6, %s5221_s6, %s5222_s14  }
0x105d   :  { %5218 = dma.done.wait [#allocation3], 256  }
0x105e   :  { %5219 = vsyncadd [#allocation3], 4294967040 }
0x105f   :  { %3986 = vsyncpa [#allocation3], 1 }

</bundles_post_ra>
